<compile_context>
chip_gen: v7x
topology: tpu7x:2x2x1
jax: 0.10.0
libtpu: 0.0.40
codegen_flags: <defaults>
</compile_context>

<pallas_src>
import math

import jax
import jax.numpy as jnp
from jax.experimental import pallas as pl
from jax.experimental.pallas import tpu as pltpu

LANES = 128


def _round_up(x, m):
    return (x + m - 1) // m * m


# ----------------------------------------------------------------------------
# Pallas kernels
# ----------------------------------------------------------------------------
def _conv_pool_kernel(p_ref, w_ref, b_ref, o_ref):
    """Fused im2col-conv + bias + ReLU + 2x2 max-pool over a block of rows.

    p_ref : (4, TM, K)  bf16 im2col patches (4 = positions inside a pool window,
                        TM = batch*pooled-spatial rows, K = k*k*Cin natural size)
    w_ref : (K, 128)    bf16 weights, N zero-padded to 128 lanes
    b_ref : (1, 128)    f32 bias, zero-padded
    o_ref : (TM, 128)   bf16 pooled activation (real channels in [:Cout])
    """
    w = w_ref[...]
    y = jnp.dot(p_ref[0], w, preferred_element_type=jnp.float32)
    y = jnp.maximum(y, jnp.dot(p_ref[1], w, preferred_element_type=jnp.float32))
    y = jnp.maximum(y, jnp.dot(p_ref[2], w, preferred_element_type=jnp.float32))
    y = jnp.maximum(y, jnp.dot(p_ref[3], w, preferred_element_type=jnp.float32))
    # relu(max_q(conv_q) + bias) == pool(relu(conv + bias))  (bias const, ReLU monotone)
    o_ref[...] = jnp.maximum(y + b_ref[...], 0.0).astype(o_ref.dtype)


def _fc_stack_kernel(x_ref, w1_ref, b1_ref, w2_ref, b2_ref, w3_ref, b3_ref, o_ref):
    """fc1+ReLU -> fc2+ReLU -> fc3, fully fused; intermediates stay in vregs/VMEM."""
    h = jnp.dot(x_ref[...], w1_ref[...], preferred_element_type=jnp.float32) + b1_ref[...]
    h = jnp.maximum(h, 0.0).astype(jnp.bfloat16)
    h = jnp.dot(h, w2_ref[...], preferred_element_type=jnp.float32) + b2_ref[...]
    h = jnp.maximum(h, 0.0).astype(jnp.bfloat16)
    o_ref[...] = jnp.dot(h, w3_ref[...], preferred_element_type=jnp.float32) + b3_ref[...]


# ----------------------------------------------------------------------------
# Pallas wrappers
# ----------------------------------------------------------------------------
def conv_relu_pool(patches_q, w_pad, b_pad, max_tile_rows=256):
    """patches_q: (4, R, K) bf16 — quadrant-stacked im2col patches, R = B*Ho*Wo.
    Returns pooled activation (R_pad, 128) bf16 (real rows in [:R])."""
    Q, R, K = patches_q.shape
    TM = min(max_tile_rows, _round_up(R, 8))
    R_pad = _round_up(R, TM)
    if R_pad != R:
        patches_q = jnp.pad(patches_q, ((0, 0), (0, R_pad - R), (0, 0)))
    grid = (R_pad // TM,)
    return pl.pallas_call(
        _conv_pool_kernel,
        out_shape=jax.ShapeDtypeStruct((R_pad, LANES), jnp.bfloat16),
        grid=grid,
        in_specs=[
            pl.BlockSpec((Q, TM, K), lambda i: (0, i, 0)),
            pl.BlockSpec((K, LANES), lambda i: (0, 0)),
            pl.BlockSpec((1, LANES), lambda i: (0, 0)),
        ],
        out_specs=pl.BlockSpec((TM, LANES), lambda i: (i, 0)),
        compiler_params=pltpu.CompilerParams(dimension_semantics=("parallel",)),
    )(patches_q, w_pad, b_pad)


def fc_stack(x, w1, b1, w2, b2, w3, b3, max_tile_rows=256):
    """x: (B, 400) bf16. Returns (B_pad, 128) f32 logits (real rows/cols in [:B, :10])."""
    B, K = x.shape
    TB = min(max_tile_rows, _round_up(B, 8))
    B_pad = _round_up(B, TB)
    if B_pad != B:
        x = jnp.pad(x, ((0, B_pad - B), (0, 0)))
    grid = (B_pad // TB,)
    return pl.pallas_call(
        _fc_stack_kernel,
        out_shape=jax.ShapeDtypeStruct((B_pad, LANES), jnp.float32),
        grid=grid,
        in_specs=[
            pl.BlockSpec((TB, K), lambda i: (i, 0)),
            pl.BlockSpec(w1.shape, lambda i: (0, 0)),
            pl.BlockSpec(b1.shape, lambda i: (0, 0)),
            pl.BlockSpec(w2.shape, lambda i: (0, 0)),
            pl.BlockSpec(b2.shape, lambda i: (0, 0)),
            pl.BlockSpec(w3.shape, lambda i: (0, 0)),
            pl.BlockSpec(b3.shape, lambda i: (0, 0)),
        ],
        out_specs=pl.BlockSpec((TB, LANES), lambda i: (i, 0)),
        compiler_params=pltpu.CompilerParams(dimension_semantics=("parallel",)),
    )(x, w1, b1, w2, b2, w3, b3)


# ----------------------------------------------------------------------------
# Glue: per-pool-quadrant im2col (valid conv, stride 1, then 2x2/2 pool),
# emitted as ONE stacked array (single write, natural K — no HBM-side K pad).
# ----------------------------------------------------------------------------
def pool_quadrant_patches(x, k):
    """x: (B,H,W,C) NHWC -> (4, B*Ho*Wo, k*k*C) patches (one slab per position
    inside each 2x2 pool window); (Ho,Wo) is the pooled output spatial size."""
    B, H, W, C = x.shape
    Hc, Wc = H - k + 1, W - k + 1
    Ho, Wo = Hc // 2, Wc // 2
    quads = []
    for py in range(2):
        for px in range(2):
            cols = []
            for dy in range(k):
                for dx in range(k):
                    r0, c0 = py + dy, px + dx
                    cols.append(x[:, r0:r0 + 2 * Ho - 1:2, c0:c0 + 2 * Wo - 1:2, :])
            quads.append(jnp.concatenate(cols, axis=-1))          # (B,Ho,Wo,k*k*C)
    q = jnp.stack(quads, axis=0)                                  # (4,B,Ho,Wo,kkC)
    return q.reshape(4, B * Ho * Wo, k * k * C), Ho, Wo


# ----------------------------------------------------------------------------
# Parameter init (torch-layout) + one-time layout preprocessing
# ----------------------------------------------------------------------------
def _uniform(key, shape, bound):
    return jax.random.uniform(key, shape, jnp.float32, -bound, bound)


def init_params(key):
    ks = jax.random.split(key, 10)
    p = {}
    fan = 3 * 5 * 5
    p["conv1_w"] = _uniform(ks[0], (6, 3, 5, 5), 1.0 / math.sqrt(fan))
    p["conv1_b"] = _uniform(ks[1], (6,), 1.0 / math.sqrt(fan))
    fan = 6 * 5 * 5
    p["conv2_w"] = _uniform(ks[2], (16, 6, 5, 5), 1.0 / math.sqrt(fan))
    p["conv2_b"] = _uniform(ks[3], (16,), 1.0 / math.sqrt(fan))
    fan = 16 * 5 * 5
    p["fc1_w"] = _uniform(ks[4], (120, fan), 1.0 / math.sqrt(fan))
    p["fc1_b"] = _uniform(ks[5], (120,), 1.0 / math.sqrt(fan))
    p["fc2_w"] = _uniform(ks[6], (84, 120), 1.0 / math.sqrt(120))
    p["fc2_b"] = _uniform(ks[7], (84,), 1.0 / math.sqrt(120))
    p["fc3_w"] = _uniform(ks[8], (10, 84), 1.0 / math.sqrt(84))
    p["fc3_b"] = _uniform(ks[9], (10,), 1.0 / math.sqrt(84))
    return p


def preprocess_params(p):
    """One-time weight transforms: im2col/NHWC reorder, N padded to 128 lanes,
    bf16 matmul operands (biases stay f32 for the f32 epilogue)."""
    pp = {}
    # conv1: (6,3,5,5) -> (75,6) -> (75,128) bf16
    w = jnp.transpose(p["conv1_w"], (0, 2, 3, 1)).reshape(6, 75).T
    pp["conv1_w"] = jnp.pad(w, ((0, 0), (0, LANES - 6))).astype(jnp.bfloat16)
    pp["conv1_b"] = jnp.zeros((1, LANES), jnp.float32).at[0, :6].set(p["conv1_b"])
    # conv2: (16,6,5,5) -> (150,16) -> (150,128) bf16
    w = jnp.transpose(p["conv2_w"], (0, 2, 3, 1)).reshape(16, 150).T
    pp["conv2_w"] = jnp.pad(w, ((0, 0), (0, LANES - 16))).astype(jnp.bfloat16)
    pp["conv2_b"] = jnp.zeros((1, LANES), jnp.float32).at[0, :16].set(p["conv2_b"])
    # fc1: permute torch's (c,h,w) input ordering to the kernel's compact
    # (h,w,c) flatten order; (400,120) -> (400,128) bf16.
    w = p["fc1_w"].reshape(120, 16, 5, 5)                     # (n, c, h, w)
    w = jnp.transpose(w, (0, 2, 3, 1)).reshape(120, 400).T    # (400, 120)
    pp["fc1_w"] = jnp.pad(w, ((0, 0), (0, LANES - 120))).astype(jnp.bfloat16)
    pp["fc1_b"] = jnp.zeros((1, LANES), jnp.float32).at[0, :120].set(p["fc1_b"])
    # fc2: (84,120) -> (128,128) bf16
    pp["fc2_w"] = (jnp.zeros((LANES, LANES), jnp.float32)
                   .at[:120, :84].set(p["fc2_w"].T).astype(jnp.bfloat16))
    pp["fc2_b"] = jnp.zeros((1, LANES), jnp.float32).at[0, :84].set(p["fc2_b"])
    # fc3: (10,84) -> (128,128) bf16
    pp["fc3_w"] = (jnp.zeros((LANES, LANES), jnp.float32)
                   .at[:84, :10].set(p["fc3_w"].T).astype(jnp.bfloat16))
    pp["fc3_b"] = jnp.zeros((1, LANES), jnp.float32).at[0, :10].set(p["fc3_b"])
    return pp


# ----------------------------------------------------------------------------
# Forward pass (mirrors Net.forward)
# ----------------------------------------------------------------------------
def net_forward(pp, x_nchw):
    B = x_nchw.shape[0]
    x = jnp.transpose(x_nchw, (0, 2, 3, 1)).astype(jnp.bfloat16)      # NHWC (B,32,32,3)

    # conv1 + ReLU + pool (one fused kernel, rows = batch*pooled-spatial)
    p1, Ho, Wo = pool_quadrant_patches(x, 5)                          # (4, B*196, 75)
    a1 = conv_relu_pool(p1, pp["conv1_w"], pp["conv1_b"])             # (R1_pad, 128) bf16
    a1 = a1[:B * Ho * Wo].reshape(B, Ho, Wo, LANES)[..., :6]          # (B,14,14,6)

    # conv2 + ReLU + pool (same fused kernel)
    p2, Ho2, Wo2 = pool_quadrant_patches(a1, 5)                       # (4, B*25, 150)
    a2 = conv_relu_pool(p2, pp["conv2_w"], pp["conv2_b"])             # (R2_pad, 128) bf16

    # Compact to the 16 real channels -> (B, 400), matching fc1_w's (h,w,c) rows.
    a2 = a2[:B * Ho2 * Wo2].reshape(B, Ho2 * Wo2, LANES)[..., :16]
    x_flat = a2.reshape(B, Ho2 * Wo2 * 16)                            # (B, 400) bf16

    out = fc_stack(x_flat, pp["fc1_w"], pp["fc1_b"],
                   pp["fc2_w"], pp["fc2_b"], pp["fc3_w"], pp["fc3_b"])  # (B_pad, 128) f32
    return out[:B, :10]


# ----------------------------------------------------------------------------
if __name__ == "__main__":
    key = jax.random.PRNGKey(0)
    k_params, k_x = jax.random.split(key)

    params = preprocess_params(init_params(k_params))
    # Input spatial size must be 32x32 (fc1 expects 16*5*5 features), batch=2.
    x = jax.random.normal(k_x, (2, 3, 32, 32), jnp.float32)

    fwd = jax.jit(net_forward)
    out = jax.block_until_ready(fwd(params, x))

    assert out.shape == (2, 10) and out.dtype == jnp.float32
    print("KERNEL_OK")
</pallas_src>

<mosaic_0001>
module attributes {stable_mosaic.version = 11 : i64} {
  func.func @_conv_pool_kernel(%arg0: i32, %arg1: memref<4x256x75xbf16, #tpu.memory_space<vmem>>, %arg2: memref<75x128xbf16, #tpu.memory_space<vmem>>, %arg3: memref<1x128xf32, #tpu.memory_space<vmem>>, %arg4: memref<256x128xbf16, #tpu.memory_space<vmem>>) attributes {dimension_semantics = [#tpu.dimension_semantics<parallel>], iteration_bounds = array<i64: 2>, scalar_prefetch = 0 : i64, scratch_operands = 0 : i64, tpu.core_type = #tpu.core_type<tc>, window_params = [{transform_indices = @transform_0, window_bounds = array<i64: 4, 256, 75>}, {pipeline_mode = #tpu.pipeline_mode<synchronous>, transform_indices = @transform_1, window_bounds = array<i64: 75, 128>}, {pipeline_mode = #tpu.pipeline_mode<synchronous>, transform_indices = @transform_2, window_bounds = array<i64: 1, 128>}, {transform_indices = @transform_3, window_bounds = array<i64: 256, 128>}]} {
    %c0 = arith.constant 0 : index
    %c0_0 = arith.constant 0 : index
    %0 = vector.load %arg2[%c0, %c0_0] : memref<75x128xbf16, #tpu.memory_space<vmem>>, vector<75x128xbf16>
    %c0_1 = arith.constant 0 : index
    %c0_2 = arith.constant 0 : index
    %c0_3 = arith.constant 0 : index
    %1 = vector.load %arg1[%c0_1, %c0_2, %c0_3] : memref<4x256x75xbf16, #tpu.memory_space<vmem>>, vector<1x256x75xbf16>
    %2 = vector.shape_cast %1 : vector<1x256x75xbf16> to vector<256x75xbf16>
    %cst = arith.constant dense<0.000000e+00> : vector<256x128xf32>
    %3 = tpu.matmul %2, %0, %cst {dimension_numbers = #tpu.dot_dimension_numbers<[1], [0], [0], [1], [0, 0, 1, 1], [], []>} : vector<256x75xbf16>, vector<75x128xbf16>, vector<256x128xf32> -> vector<256x128xf32>
    %c1 = arith.constant 1 : index
    %c0_4 = arith.constant 0 : index
    %c0_5 = arith.constant 0 : index
    %4 = vector.load %arg1[%c1, %c0_4, %c0_5] : memref<4x256x75xbf16, #tpu.memory_space<vmem>>, vector<1x256x75xbf16>
    %5 = vector.shape_cast %4 : vector<1x256x75xbf16> to vector<256x75xbf16>
    %cst_6 = arith.constant dense<0.000000e+00> : vector<256x128xf32>
    %6 = tpu.matmul %5, %0, %cst_6 {dimension_numbers = #tpu.dot_dimension_numbers<[1], [0], [0], [1], [0, 0, 1, 1], [], []>} : vector<256x75xbf16>, vector<75x128xbf16>, vector<256x128xf32> -> vector<256x128xf32>
    %7 = arith.maximumf %3, %6 : vector<256x128xf32>
    %c2 = arith.constant 2 : index
    %c0_7 = arith.constant 0 : index
    %c0_8 = arith.constant 0 : index
    %8 = vector.load %arg1[%c2, %c0_7, %c0_8] : memref<4x256x75xbf16, #tpu.memory_space<vmem>>, vector<1x256x75xbf16>
    %9 = vector.shape_cast %8 : vector<1x256x75xbf16> to vector<256x75xbf16>
    %cst_9 = arith.constant dense<0.000000e+00> : vector<256x128xf32>
    %10 = tpu.matmul %9, %0, %cst_9 {dimension_numbers = #tpu.dot_dimension_numbers<[1], [0], [0], [1], [0, 0, 1, 1], [], []>} : vector<256x75xbf16>, vector<75x128xbf16>, vector<256x128xf32> -> vector<256x128xf32>
    %11 = arith.maximumf %7, %10 : vector<256x128xf32>
    %c3 = arith.constant 3 : index
    %c0_10 = arith.constant 0 : index
    %c0_11 = arith.constant 0 : index
    %12 = vector.load %arg1[%c3, %c0_10, %c0_11] : memref<4x256x75xbf16, #tpu.memory_space<vmem>>, vector<1x256x75xbf16>
    %13 = vector.shape_cast %12 : vector<1x256x75xbf16> to vector<256x75xbf16>
    %cst_12 = arith.constant dense<0.000000e+00> : vector<256x128xf32>
    %14 = tpu.matmul %13, %0, %cst_12 {dimension_numbers = #tpu.dot_dimension_numbers<[1], [0], [0], [1], [0, 0, 1, 1], [], []>} : vector<256x75xbf16>, vector<75x128xbf16>, vector<256x128xf32> -> vector<256x128xf32>
    %15 = arith.maximumf %11, %14 : vector<256x128xf32>
    %c0_13 = arith.constant 0 : index
    %c0_14 = arith.constant 0 : index
    %16 = vector.load %arg3[%c0_13, %c0_14] : memref<1x128xf32, #tpu.memory_space<vmem>>, vector<1x128xf32>
    %17 = vector.broadcast %16 : vector<1x128xf32> to vector<256x128xf32>
    %18 = arith.addf %15, %17 : vector<256x128xf32>
    %cst_15 = arith.constant 0.000000e+00 : f32
    %19 = vector.broadcast %cst_15 : f32 to vector<256x128xf32>
    %20 = arith.maximumf %18, %19 : vector<256x128xf32>
    %21 = arith.truncf %20 : vector<256x128xf32> to vector<256x128xbf16>
    %c0_16 = arith.constant 0 : index
    %c0_17 = arith.constant 0 : index
    %22 = vector.load %arg4[%c0_16, %c0_17] : memref<256x128xbf16, #tpu.memory_space<vmem>>, vector<256x128xbf16>
    tpu.vector_store %arg4[%c0_16, %c0_17], %21 {strides = array<i32>} : memref<256x128xbf16, #tpu.memory_space<vmem>>, vector<256x128xbf16>,
    return
  }
  func.func @transform_0(%arg0: i32) -> (i32, i32, i32) {
    %c0_i32 = arith.constant 0 : i32
    %c0_i32_0 = arith.constant 0 : i32
    %c0_i32_1 = arith.constant 0 : i32
    return %c0_i32, %arg0, %c0_i32_0 : i32, i32, i32
  }
  func.func @transform_1(%arg0: i32) -> (i32, i32) {
    %c0_i32 = arith.constant 0 : i32
    %c0_i32_0 = arith.constant 0 : i32
    %c0_i32_1 = arith.constant 0 : i32
    return %c0_i32, %c0_i32_0 : i32, i32
  }
  func.func @transform_2(%arg0: i32) -> (i32, i32) {
    %c0_i32 = arith.constant 0 : i32
    %c0_i32_0 = arith.constant 0 : i32
    %c0_i32_1 = arith.constant 0 : i32
    return %c0_i32, %c0_i32_0 : i32, i32
  }
  func.func @transform_3(%arg0: i32) -> (i32, i32) {
    %c0_i32 = arith.constant 0 : i32
    %c0_i32_0 = arith.constant 0 : i32
    return %arg0, %c0_i32 : i32, i32
  }
}

module attributes {stable_mosaic.version = 11 : i64} {
  func.func @_conv_pool_kernel(%arg0: i32, %arg1: memref<4x56x150xbf16, #tpu.memory_space<vmem>>, %arg2: memref<150x128xbf16, #tpu.memory_space<vmem>>, %arg3: memref<1x128xf32, #tpu.memory_space<vmem>>, %arg4: memref<56x128xbf16, #tpu.memory_space<vmem>>) attributes {dimension_semantics = [#tpu.dimension_semantics<parallel>], iteration_bounds = array<i64: 1>, scalar_prefetch = 0 : i64, scratch_operands = 0 : i64, tpu.core_type = #tpu.core_type<tc>, window_params = [{transform_indices = @transform_0, window_bounds = array<i64: 4, 56, 150>}, {pipeline_mode = #tpu.pipeline_mode<synchronous>, transform_indices = @transform_1, window_bounds = array<i64: 150, 128>}, {pipeline_mode = #tpu.pipeline_mode<synchronous>, transform_indices = @transform_2, window_bounds = array<i64: 1, 128>}, {transform_indices = @transform_3, window_bounds = array<i64: 56, 128>}]} {
    %c0 = arith.constant 0 : index
    %c0_0 = arith.constant 0 : index
    %0 = vector.load %arg2[%c0, %c0_0] : memref<150x128xbf16, #tpu.memory_space<vmem>>, vector<150x128xbf16>
    %c0_1 = arith.constant 0 : index
    %c0_2 = arith.constant 0 : index
    %c0_3 = arith.constant 0 : index
    %1 = vector.load %arg1[%c0_1, %c0_2, %c0_3] : memref<4x56x150xbf16, #tpu.memory_space<vmem>>, vector<1x56x150xbf16>
    %2 = vector.shape_cast %1 : vector<1x56x150xbf16> to vector<56x150xbf16>
    %cst = arith.constant dense<0.000000e+00> : vector<56x128xf32>
    %3 = tpu.matmul %2, %0, %cst {dimension_numbers = #tpu.dot_dimension_numbers<[1], [0], [0], [1], [0, 0, 1, 1], [], []>} : vector<56x150xbf16>, vector<150x128xbf16>, vector<56x128xf32> -> vector<56x128xf32>
    %c1 = arith.constant 1 : index
    %c0_4 = arith.constant 0 : index
    %c0_5 = arith.constant 0 : index
    %4 = vector.load %arg1[%c1, %c0_4, %c0_5] : memref<4x56x150xbf16, #tpu.memory_space<vmem>>, vector<1x56x150xbf16>
    %5 = vector.shape_cast %4 : vector<1x56x150xbf16> to vector<56x150xbf16>
    %cst_6 = arith.constant dense<0.000000e+00> : vector<56x128xf32>
    %6 = tpu.matmul %5, %0, %cst_6 {dimension_numbers = #tpu.dot_dimension_numbers<[1], [0], [0], [1], [0, 0, 1, 1], [], []>} : vector<56x150xbf16>, vector<150x128xbf16>, vector<56x128xf32> -> vector<56x128xf32>
    %7 = arith.maximumf %3, %6 : vector<56x128xf32>
    %c2 = arith.constant 2 : index
    %c0_7 = arith.constant 0 : index
    %c0_8 = arith.constant 0 : index
    %8 = vector.load %arg1[%c2, %c0_7, %c0_8] : memref<4x56x150xbf16, #tpu.memory_space<vmem>>, vector<1x56x150xbf16>
    %9 = vector.shape_cast %8 : vector<1x56x150xbf16> to vector<56x150xbf16>
    %cst_9 = arith.constant dense<0.000000e+00> : vector<56x128xf32>
    %10 = tpu.matmul %9, %0, %cst_9 {dimension_numbers = #tpu.dot_dimension_numbers<[1], [0], [0], [1], [0, 0, 1, 1], [], []>} : vector<56x150xbf16>, vector<150x128xbf16>, vector<56x128xf32> -> vector<56x128xf32>
    %11 = arith.maximumf %7, %10 : vector<56x128xf32>
    %c3 = arith.constant 3 : index
    %c0_10 = arith.constant 0 : index
    %c0_11 = arith.constant 0 : index
    %12 = vector.load %arg1[%c3, %c0_10, %c0_11] : memref<4x56x150xbf16, #tpu.memory_space<vmem>>, vector<1x56x150xbf16>
    %13 = vector.shape_cast %12 : vector<1x56x150xbf16> to vector<56x150xbf16>
    %cst_12 = arith.constant dense<0.000000e+00> : vector<56x128xf32>
    %14 = tpu.matmul %13, %0, %cst_12 {dimension_numbers = #tpu.dot_dimension_numbers<[1], [0], [0], [1], [0, 0, 1, 1], [], []>} : vector<56x150xbf16>, vector<150x128xbf16>, vector<56x128xf32> -> vector<56x128xf32>
    %15 = arith.maximumf %11, %14 : vector<56x128xf32>
    %c0_13 = arith.constant 0 : index
    %c0_14 = arith.constant 0 : index
    %16 = vector.load %arg3[%c0_13, %c0_14] : memref<1x128xf32, #tpu.memory_space<vmem>>, vector<1x128xf32>
    %17 = vector.broadcast %16 : vector<1x128xf32> to vector<56x128xf32>
    %18 = arith.addf %15, %17 : vector<56x128xf32>
    %cst_15 = arith.constant 0.000000e+00 : f32
    %19 = vector.broadcast %cst_15 : f32 to vector<56x128xf32>
    %20 = arith.maximumf %18, %19 : vector<56x128xf32>
    %21 = arith.truncf %20 : vector<56x128xf32> to vector<56x128xbf16>
    %c0_16 = arith.constant 0 : index
    %c0_17 = arith.constant 0 : index
    %22 = vector.load %arg4[%c0_16, %c0_17] : memref<56x128xbf16, #tpu.memory_space<vmem>>, vector<56x128xbf16>
    tpu.vector_store %arg4[%c0_16, %c0_17], %21 {strides = array<i32>} : memref<56x128xbf16, #tpu.memory_space<vmem>>, vector<56x128xbf16>,
    return
  }
  func.func @transform_0(%arg0: i32) -> (i32, i32, i32) {
    %c0_i32 = arith.constant 0 : i32
    %c0_i32_0 = arith.constant 0 : i32
    %c0_i32_1 = arith.constant 0 : i32
    return %c0_i32, %arg0, %c0_i32_0 : i32, i32, i32
  }
  func.func @transform_1(%arg0: i32) -> (i32, i32) {
    %c0_i32 = arith.constant 0 : i32
    %c0_i32_0 = arith.constant 0 : i32
    %c0_i32_1 = arith.constant 0 : i32
    return %c0_i32, %c0_i32_0 : i32, i32
  }
  func.func @transform_2(%arg0: i32) -> (i32, i32) {
    %c0_i32 = arith.constant 0 : i32
    %c0_i32_0 = arith.constant 0 : i32
    %c0_i32_1 = arith.constant 0 : i32
    return %c0_i32, %c0_i32_0 : i32, i32
  }
  func.func @transform_3(%arg0: i32) -> (i32, i32) {
    %c0_i32 = arith.constant 0 : i32
    %c0_i32_0 = arith.constant 0 : i32
    return %arg0, %c0_i32 : i32, i32
  }
}

module attributes {stable_mosaic.version = 11 : i64} {
  func.func @_fc_stack_kernel(%arg0: i32, %arg1: memref<8x400xbf16, #tpu.memory_space<vmem>>, %arg2: memref<400x128xbf16, #tpu.memory_space<vmem>>, %arg3: memref<1x128xf32, #tpu.memory_space<vmem>>, %arg4: memref<128x128xbf16, #tpu.memory_space<vmem>>, %arg5: memref<1x128xf32, #tpu.memory_space<vmem>>, %arg6: memref<128x128xbf16, #tpu.memory_space<vmem>>, %arg7: memref<1x128xf32, #tpu.memory_space<vmem>>, %arg8: memref<8x128xf32, #tpu.memory_space<vmem>>) attributes {dimension_semantics = [#tpu.dimension_semantics<parallel>], iteration_bounds = array<i64: 1>, scalar_prefetch = 0 : i64, scratch_operands = 0 : i64, tpu.core_type = #tpu.core_type<tc>, window_params = [{transform_indices = @transform_0, window_bounds = array<i64: 8, 400>}, {pipeline_mode = #tpu.pipeline_mode<synchronous>, transform_indices = @transform_1, window_bounds = array<i64: 400, 128>}, {pipeline_mode = #tpu.pipeline_mode<synchronous>, transform_indices = @transform_2, window_bounds = array<i64: 1, 128>}, {pipeline_mode = #tpu.pipeline_mode<synchronous>, transform_indices = @transform_3, window_bounds = array<i64: 128, 128>}, {pipeline_mode = #tpu.pipeline_mode<synchronous>, transform_indices = @transform_4, window_bounds = array<i64: 1, 128>}, {pipeline_mode = #tpu.pipeline_mode<synchronous>, transform_indices = @transform_5, window_bounds = array<i64: 128, 128>}, {pipeline_mode = #tpu.pipeline_mode<synchronous>, transform_indices = @transform_6, window_bounds = array<i64: 1, 128>}, {transform_indices = @transform_7, window_bounds = array<i64: 8, 128>}]} {
    %c0 = arith.constant 0 : index
    %c0_0 = arith.constant 0 : index
    %0 = vector.load %arg1[%c0, %c0_0] : memref<8x400xbf16, #tpu.memory_space<vmem>>, vector<8x400xbf16>
    %c0_1 = arith.constant 0 : index
    %c0_2 = arith.constant 0 : index
    %1 = vector.load %arg2[%c0_1, %c0_2] : memref<400x128xbf16, #tpu.memory_space<vmem>>, vector<400x128xbf16>
    %cst = arith.constant dense<0.000000e+00> : vector<8x128xf32>
    %2 = tpu.matmul %0, %1, %cst {dimension_numbers = #tpu.dot_dimension_numbers<[1], [0], [0], [1], [0, 0, 1, 1], [], []>} : vector<8x400xbf16>, vector<400x128xbf16>, vector<8x128xf32> -> vector<8x128xf32>
    %c0_3 = arith.constant 0 : index
    %c0_4 = arith.constant 0 : index
    %3 = vector.load %arg3[%c0_3, %c0_4] : memref<1x128xf32, #tpu.memory_space<vmem>>, vector<1x128xf32>
    %4 = vector.broadcast %3 : vector<1x128xf32> to vector<8x128xf32>
    %5 = arith.addf %2, %4 : vector<8x128xf32>
    %cst_5 = arith.constant 0.000000e+00 : f32
    %6 = vector.broadcast %cst_5 : f32 to vector<8x128xf32>
    %7 = arith.maximumf %5, %6 : vector<8x128xf32>
    %8 = arith.truncf %7 : vector<8x128xf32> to vector<8x128xbf16>
    %c0_6 = arith.constant 0 : index
    %c0_7 = arith.constant 0 : index
    %9 = vector.load %arg4[%c0_6, %c0_7] : memref<128x128xbf16, #tpu.memory_space<vmem>>, vector<128x128xbf16>
    %cst_8 = arith.constant dense<0.000000e+00> : vector<8x128xf32>
    %10 = tpu.matmul %8, %9, %cst_8 {dimension_numbers = #tpu.dot_dimension_numbers<[1], [0], [0], [1], [0, 0, 1, 1], [], []>} : vector<8x128xbf16>, vector<128x128xbf16>, vector<8x128xf32> -> vector<8x128xf32>
    %c0_9 = arith.constant 0 : index
    %c0_10 = arith.constant 0 : index
    %11 = vector.load %arg5[%c0_9, %c0_10] : memref<1x128xf32, #tpu.memory_space<vmem>>, vector<1x128xf32>
    %12 = vector.broadcast %11 : vector<1x128xf32> to vector<8x128xf32>
    %13 = arith.addf %10, %12 : vector<8x128xf32>
    %cst_11 = arith.constant 0.000000e+00 : f32
    %14 = vector.broadcast %cst_11 : f32 to vector<8x128xf32>
    %15 = arith.maximumf %13, %14 : vector<8x128xf32>
    %16 = arith.truncf %15 : vector<8x128xf32> to vector<8x128xbf16>
    %c0_12 = arith.constant 0 : index
    %c0_13 = arith.constant 0 : index
    %17 = vector.load %arg6[%c0_12, %c0_13] : memref<128x128xbf16, #tpu.memory_space<vmem>>, vector<128x128xbf16>
    %cst_14 = arith.constant dense<0.000000e+00> : vector<8x128xf32>
    %18 = tpu.matmul %16, %17, %cst_14 {dimension_numbers = #tpu.dot_dimension_numbers<[1], [0], [0], [1], [0, 0, 1, 1], [], []>} : vector<8x128xbf16>, vector<128x128xbf16>, vector<8x128xf32> -> vector<8x128xf32>
    %c0_15 = arith.constant 0 : index
    %c0_16 = arith.constant 0 : index
    %19 = vector.load %arg7[%c0_15, %c0_16] : memref<1x128xf32, #tpu.memory_space<vmem>>, vector<1x128xf32>
    %20 = vector.broadcast %19 : vector<1x128xf32> to vector<8x128xf32>
    %21 = arith.addf %18, %20 : vector<8x128xf32>
    %c0_17 = arith.constant 0 : index
    %c0_18 = arith.constant 0 : index
    %22 = vector.load %arg8[%c0_17, %c0_18] : memref<8x128xf32, #tpu.memory_space<vmem>>, vector<8x128xf32>
    tpu.vector_store %arg8[%c0_17, %c0_18], %21 {strides = array<i32>} : memref<8x128xf32, #tpu.memory_space<vmem>>, vector<8x128xf32>,
    return
  }
  func.func @transform_0(%arg0: i32) -> (i32, i32) {
    %c0_i32 = arith.constant 0 : i32
    %c0_i32_0 = arith.constant 0 : i32
    return %arg0, %c0_i32 : i32, i32
  }
  func.func @transform_1(%arg0: i32) -> (i32, i32) {
    %c0_i32 = arith.constant 0 : i32
    %c0_i32_0 = arith.constant 0 : i32
    %c0_i32_1 = arith.constant 0 : i32
    return %c0_i32, %c0_i32_0 : i32, i32
  }
  func.func @transform_2(%arg0: i32) -> (i32, i32) {
    %c0_i32 = arith.constant 0 : i32
    %c0_i32_0 = arith.constant 0 : i32
    %c0_i32_1 = arith.constant 0 : i32
    return %c0_i32, %c0_i32_0 : i32, i32
  }
  func.func @transform_3(%arg0: i32) -> (i32, i32) {
    %c0_i32 = arith.constant 0 : i32
    %c0_i32_0 = arith.constant 0 : i32
    %c0_i32_1 = arith.constant 0 : i32
    return %c0_i32, %c0_i32_0 : i32, i32
  }
  func.func @transform_4(%arg0: i32) -> (i32, i32) {
    %c0_i32 = arith.constant 0 : i32
    %c0_i32_0 = arith.constant 0 : i32
    %c0_i32_1 = arith.constant 0 : i32
    return %c0_i32, %c0_i32_0 : i32, i32
  }
  func.func @transform_5(%arg0: i32) -> (i32, i32) {
    %c0_i32 = arith.constant 0 : i32
    %c0_i32_0 = arith.constant 0 : i32
    %c0_i32_1 = arith.constant 0 : i32
    return %c0_i32, %c0_i32_0 : i32, i32
  }
  func.func @transform_6(%arg0: i32) -> (i32, i32) {
    %c0_i32 = arith.constant 0 : i32
    %c0_i32_0 = arith.constant 0 : i32
    %c0_i32_1 = arith.constant 0 : i32
    return %c0_i32, %c0_i32_0 : i32, i32
  }
  func.func @transform_7(%arg0: i32) -> (i32, i32) {
    %c0_i32 = arith.constant 0 : i32
    %c0_i32_0 = arith.constant 0 : i32
    return %arg0, %c0_i32 : i32, i32
  }
}

</mosaic_0001>

<bundles_post_ra>
// kernel: net_forward.3
= control target key start
LH: loop header
LB: loop body
LE: loop exit
PB: predicated region body
PF: predicated region fallthrough
CT: control target
= control target key end

     0   :  { %s3241_s12 = smov 0   ;;  %s3243_s13 = smov 0   ;;  %s3913_s0 = inlined_call_operand.vmem [shape: bf16[4,512,75], index: 0, kind: input, shape index: {}]   ;;  %s3914_s1 = inlined_call_operand.vmem [shape: bf16[75,128], index: 1, kind: input, shape index: {}]   ;;  %s3915_s2 = inlined_call_operand.vmem [shape: f32[1,128], index: 2, kind: input, shape index: {}]   ;;  %s3916_s3 = inlined_call_operand.vmem [shape: bf16[512,128], index: 3, kind: output, shape index: {}]  }
   0x1   :  { %s3245_s14 = smov 0  }
   0x2 LB: > { %s2447_s15 = sadd.s32 4294967295, %s3218_s14   ;;  %s3258_s16 = sadd.s32 1, %s3218_s14   ;;  %s3218_s14 = sphi %s3245_s14, %s4002_s14   ;;  %s3214_s13 = sphi %s3243_s13, %s4001_s13   ;;  %s3210_s12 = sphi %s3241_s12, %s4000_s12  }
   0x3   : > { %s17_s17 = ssub.s32 %s3218_s14, %s3258_s16  ;;  %s20_s18 = sadd.s32 1, %s3214_s13 }
   0x4   : > { %p18_p0 = scmp.eq.s32.totalorder %s17_s17, 0  ;;  %p27_p1 = scmp.ne.s32.totalorder %s3214_s13, %s3210_s12 }
   0x5   : > { %p28_p2 = scmp.eq.s32.totalorder %s3218_s14, 0  ;;  %p2450_p4 = scmp.ge.s32.totalorder %s3218_s14, 2 }
   0x6   : > { %s3267_s19 = scalar_select %p18_p0, %s3214_s13, %s20_s18  }
   0x7   : > { %p29_p3 = por %p28_p2, %p27_p1  ;;  %127 = sbr.rel (%p2450_p4) target bundleno = 50 (0x32), region = 24 }
   0xe   : > { %130 = sbr.rel (!%p29_p3) target bundleno = 50 (0x32), region = 28  ;;  %s132_s20 = sand.u32 (%p29_p3), 1, %s3214_s13  }
   0xf   : > { %s2722_s21 = sshll.u32 (%p29_p3), %s3218_s14, 7  ;;  %s2451_s22 = sshll.u32 (%p29_p3), %s132_s20, 9 }
  0x10   : > { %s3275_s25 = scalar_lea.vmem (%p29_p3), %s3913_s0, %s2722_s21  ;;  %s3280_s26 = scalar_lea.vmem (%p29_p3), [#allocation2], %s2451_s22 }
  0x11   : > { %v153_v0 = vld [vmem:[%s3275_s25] sm:$0xff] (%p29_p3)   ;;  %v157_v1 = vld [vmem:[%s3275_s25 + $0x8] sm:$0xff] (%p29_p3)   ;;  %v161_v2 = vld [vmem:[%s3275_s25 + $0x10] sm:$0xff] (%p29_p3)  }
  0x12   : > { %154 = vst [vmem:[%s3280_s26] sm:$0xff] (%p29_p3), %v153_v0   ;;  %158 = vst [vmem:[%s3280_s26 + $0x8] sm:$0xff] (%p29_p3), %v157_v1   ;;  %v165_v3 = vld [vmem:[%s3275_s25 + $0x18] sm:$0xff] (%p29_p3)   ;;  %v169_v4 = vld [vmem:[%s3275_s25 + $0x20] sm:$0xff] (%p29_p3)  }
  0x13   : > { %162 = vst [vmem:[%s3280_s26 + $0x10] sm:$0xff] (%p29_p3), %v161_v2   ;;  %v173_v5 = vld [vmem:[%s3275_s25 + $0x28] sm:$0xff] (%p29_p3)   ;;  %166 = vst [vmem:[%s3280_s26 + $0x18] sm:$0xff] (%p29_p3), %v165_v3   ;;  %v177_v6 = vld [vmem:[%s3275_s25 + $0x30] sm:$0xff] (%p29_p3)  }
  0x14   : > { %170 = vst [vmem:[%s3280_s26 + $0x20] sm:$0xff] (%p29_p3), %v169_v4   ;;  %174 = vst [vmem:[%s3280_s26 + $0x28] sm:$0xff] (%p29_p3), %v173_v5   ;;  %v181_v7 = vld [vmem:[%s3275_s25 + $0x38] sm:$0xff] (%p29_p3)   ;;  %v185_v8 = vld [vmem:[%s3275_s25 + $0x40] sm:$0xff] (%p29_p3)  }
  0x15   : > { %178 = vst [vmem:[%s3280_s26 + $0x30] sm:$0xff] %v177_v6   ;;  %182 = vst [vmem:[%s3280_s26 + $0x38] sm:$0xff] %v181_v7   ;;  %v189_v9 = vld [vmem:[%s3275_s25 + $0x48] sm:$0xff]   ;;  %v193_v10 = vld [vmem:[%s3275_s25 + $0x50] sm:$0xff]  }
  0x16   : > { %186 = vst [vmem:[%s3280_s26 + $0x40] sm:$0xff] %v185_v8   ;;  %v197_v11 = vld [vmem:[%s3275_s25 + $0x58] sm:$0xff]   ;;  %190 = vst [vmem:[%s3280_s26 + $0x48] sm:$0xff] %v189_v9   ;;  %v201_v12 = vld [vmem:[%s3275_s25 + $0x60] sm:$0xff]  }
  0x17   : > { %194 = vst [vmem:[%s3280_s26 + $0x50] sm:$0xff] %v193_v10   ;;  %198 = vst [vmem:[%s3280_s26 + $0x58] sm:$0xff] %v197_v11   ;;  %v205_v13 = vld [vmem:[%s3275_s25 + $0x68] sm:$0xff]   ;;  %v209_v14 = vld [vmem:[%s3275_s25 + $0x70] sm:$0xff]  }
  0x18   : > { %202 = vst [vmem:[%s3280_s26 + $0x60] sm:$0xff] %v201_v12   ;;  %206 = vst [vmem:[%s3280_s26 + $0x68] sm:$0xff] %v205_v13   ;;  %v213_v15 = vld [vmem:[%s3275_s25 + $0x78] sm:$0xff]   ;;  %v217_v16 = vld [vmem:[%s3275_s25 + $0x100] sm:$0xff]  }
  0x19   : > { %210 = vst [vmem:[%s3280_s26 + $0x70] sm:$0xff] %v209_v14   ;;  %v221_v17 = vld [vmem:[%s3275_s25 + $0x108] sm:$0xff]   ;;  %214 = vst [vmem:[%s3280_s26 + $0x78] sm:$0xff] %v213_v15   ;;  %v225_v18 = vld [vmem:[%s3275_s25 + $0x110] sm:$0xff]  }
  0x1a   : > { %218 = vst [vmem:[%s3280_s26 + $0x80] sm:$0xff] %v217_v16   ;;  %222 = vst [vmem:[%s3280_s26 + $0x88] sm:$0xff] %v221_v17   ;;  %v229_v19 = vld [vmem:[%s3275_s25 + $0x118] sm:$0xff]   ;;  %v233_v20 = vld [vmem:[%s3275_s25 + $0x120] sm:$0xff]  }
  0x1b   : > { %226 = vst [vmem:[%s3280_s26 + $0x90] sm:$0xff] %v225_v18   ;;  %230 = vst [vmem:[%s3280_s26 + $0x98] sm:$0xff] %v229_v19   ;;  %v237_v21 = vld [vmem:[%s3275_s25 + $0x128] sm:$0xff]   ;;  %v241_v22 = vld [vmem:[%s3275_s25 + $0x130] sm:$0xff]  }
  0x1c   : > { %234 = vst [vmem:[%s3280_s26 + $0xa0] sm:$0xff] %v233_v20   ;;  %v245_v23 = vld [vmem:[%s3275_s25 + $0x138] sm:$0xff]   ;;  %238 = vst [vmem:[%s3280_s26 + $0xa8] sm:$0xff] %v237_v21   ;;  %v249_v24 = vld [vmem:[%s3275_s25 + $0x140] sm:$0xff]  }
  0x1d   : > { %242 = vst [vmem:[%s3280_s26 + $0xb0] sm:$0xff] %v241_v22   ;;  %246 = vst [vmem:[%s3280_s26 + $0xb8] sm:$0xff] %v245_v23   ;;  %v253_v25 = vld [vmem:[%s3275_s25 + $0x148] sm:$0xff]   ;;  %v257_v26 = vld [vmem:[%s3275_s25 + $0x150] sm:$0xff]  }
  0x1e   : > { %250 = vst [vmem:[%s3280_s26 + $0xc0] sm:$0xff] %v249_v24   ;;  %254 = vst [vmem:[%s3280_s26 + $0xc8] sm:$0xff] %v253_v25   ;;  %v261_v27 = vld [vmem:[%s3275_s25 + $0x158] sm:$0xff]   ;;  %v265_v28 = vld [vmem:[%s3275_s25 + $0x160] sm:$0xff]  }
  0x1f   : > { %258 = vst [vmem:[%s3280_s26 + $0xd0] sm:$0xff] %v257_v26   ;;  %v269_v29 = vld [vmem:[%s3275_s25 + $0x168] sm:$0xff]   ;;  %262 = vst [vmem:[%s3280_s26 + $0xd8] sm:$0xff] %v261_v27   ;;  %v273_v30 = vld [vmem:[%s3275_s25 + $0x170] sm:$0xff]  }
  0x20   : > { %266 = vst [vmem:[%s3280_s26 + $0xe0] sm:$0xff] %v265_v28   ;;  %270 = vst [vmem:[%s3280_s26 + $0xe8] sm:$0xff] %v269_v29   ;;  %v277_v31 = vld [vmem:[%s3275_s25 + $0x178] sm:$0xff]   ;;  %v281_v32 = vld [vmem:[%s3275_s25 + $0x200] sm:$0xff]  }
  0x21   : > { %274 = vst [vmem:[%s3280_s26 + $0xf0] sm:$0xff] %v273_v30   ;;  %278 = vst [vmem:[%s3280_s26 + $0xf8] sm:$0xff] %v277_v31   ;;  %v285_v33 = vld [vmem:[%s3275_s25 + $0x208] sm:$0xff]   ;;  %v289_v34 = vld [vmem:[%s3275_s25 + $0x210] sm:$0xff]  }
  0x22   : > { %282 = vst [vmem:[%s3280_s26 + $0x100] sm:$0xff] %v281_v32   ;;  %v293_v35 = vld [vmem:[%s3275_s25 + $0x218] sm:$0xff]   ;;  %286 = vst [vmem:[%s3280_s26 + $0x108] sm:$0xff] %v285_v33   ;;  %v297_v36 = vld [vmem:[%s3275_s25 + $0x220] sm:$0xff]  }
  0x23   : > { %290 = vst [vmem:[%s3280_s26 + $0x110] sm:$0xff] %v289_v34   ;;  %294 = vst [vmem:[%s3280_s26 + $0x118] sm:$0xff] %v293_v35   ;;  %v301_v37 = vld [vmem:[%s3275_s25 + $0x228] sm:$0xff]   ;;  %v305_v38 = vld [vmem:[%s3275_s25 + $0x230] sm:$0xff]  }
  0x24   : > { %298 = vst [vmem:[%s3280_s26 + $0x120] sm:$0xff] %v297_v36   ;;  %302 = vst [vmem:[%s3280_s26 + $0x128] sm:$0xff] %v301_v37   ;;  %v309_v39 = vld [vmem:[%s3275_s25 + $0x238] sm:$0xff]   ;;  %v313_v40 = vld [vmem:[%s3275_s25 + $0x240] sm:$0xff]  }
  0x25   : > { %306 = vst [vmem:[%s3280_s26 + $0x130] sm:$0xff] %v305_v38   ;;  %v317_v41 = vld [vmem:[%s3275_s25 + $0x248] sm:$0xff]   ;;  %310 = vst [vmem:[%s3280_s26 + $0x138] sm:$0xff] %v309_v39   ;;  %v321_v42 = vld [vmem:[%s3275_s25 + $0x250] sm:$0xff]  }
  0x26   : > { %314 = vst [vmem:[%s3280_s26 + $0x140] sm:$0xff] %v313_v40   ;;  %318 = vst [vmem:[%s3280_s26 + $0x148] sm:$0xff] %v317_v41   ;;  %v325_v43 = vld [vmem:[%s3275_s25 + $0x258] sm:$0xff]   ;;  %v329_v44 = vld [vmem:[%s3275_s25 + $0x260] sm:$0xff]  }
  0x27   : > { %322 = vst [vmem:[%s3280_s26 + $0x150] sm:$0xff] %v321_v42   ;;  %326 = vst [vmem:[%s3280_s26 + $0x158] sm:$0xff] %v325_v43   ;;  %v333_v45 = vld [vmem:[%s3275_s25 + $0x268] sm:$0xff]   ;;  %v337_v46 = vld [vmem:[%s3275_s25 + $0x270] sm:$0xff]  }
  0x28   : > { %330 = vst [vmem:[%s3280_s26 + $0x160] sm:$0xff] %v329_v44   ;;  %v341_v47 = vld [vmem:[%s3275_s25 + $0x278] sm:$0xff]   ;;  %334 = vst [vmem:[%s3280_s26 + $0x168] sm:$0xff] %v333_v45   ;;  %v345_v48 = vld [vmem:[%s3275_s25 + $0x300] sm:$0xff]  }
  0x29   : > { %338 = vst [vmem:[%s3280_s26 + $0x170] sm:$0xff] %v337_v46   ;;  %342 = vst [vmem:[%s3280_s26 + $0x178] sm:$0xff] %v341_v47   ;;  %v349_v49 = vld [vmem:[%s3275_s25 + $0x308] sm:$0xff]   ;;  %v353_v50 = vld [vmem:[%s3275_s25 + $0x310] sm:$0xff]  }
  0x2a   : > { %346 = vst [vmem:[%s3280_s26 + $0x180] sm:$0xff] %v345_v48   ;;  %350 = vst [vmem:[%s3280_s26 + $0x188] sm:$0xff] %v349_v49   ;;  %v357_v51 = vld [vmem:[%s3275_s25 + $0x318] sm:$0xff]   ;;  %v361_v52 = vld [vmem:[%s3275_s25 + $0x320] sm:$0xff]  }
  0x2b   : > { %354 = vst [vmem:[%s3280_s26 + $0x190] sm:$0xff] %v353_v50   ;;  %v365_v53 = vld [vmem:[%s3275_s25 + $0x328] sm:$0xff]   ;;  %358 = vst [vmem:[%s3280_s26 + $0x198] sm:$0xff] %v357_v51   ;;  %v369_v54 = vld [vmem:[%s3275_s25 + $0x330] sm:$0xff]  }
  0x2c   : > { %362 = vst [vmem:[%s3280_s26 + $0x1a0] sm:$0xff] %v361_v52   ;;  %366 = vst [vmem:[%s3280_s26 + $0x1a8] sm:$0xff] %v365_v53   ;;  %v373_v55 = vld [vmem:[%s3275_s25 + $0x338] sm:$0xff]   ;;  %v377_v56 = vld [vmem:[%s3275_s25 + $0x340] sm:$0xff]  }
  0x2d   : > { %370 = vst [vmem:[%s3280_s26 + $0x1b0] sm:$0xff] %v369_v54   ;;  %374 = vst [vmem:[%s3280_s26 + $0x1b8] sm:$0xff] %v373_v55   ;;  %v381_v57 = vld [vmem:[%s3275_s25 + $0x348] sm:$0xff]   ;;  %v385_v58 = vld [vmem:[%s3275_s25 + $0x350] sm:$0xff]  }
  0x2e   : > { %378 = vst [vmem:[%s3280_s26 + $0x1c0] sm:$0xff] %v377_v56   ;;  %v389_v59 = vld [vmem:[%s3275_s25 + $0x358] sm:$0xff]   ;;  %382 = vst [vmem:[%s3280_s26 + $0x1c8] sm:$0xff] %v381_v57   ;;  %v393_v60 = vld [vmem:[%s3275_s25 + $0x360] sm:$0xff]  }
  0x2f   : > { %386 = vst [vmem:[%s3280_s26 + $0x1d0] sm:$0xff] %v385_v58   ;;  %390 = vst [vmem:[%s3280_s26 + $0x1d8] sm:$0xff] %v389_v59   ;;  %v397_v61 = vld [vmem:[%s3275_s25 + $0x368] sm:$0xff]   ;;  %v401_v62 = vld [vmem:[%s3275_s25 + $0x370] sm:$0xff]  }
  0x30   : > { %394 = vst [vmem:[%s3280_s26 + $0x1e0] sm:$0xff] %v393_v60   ;;  %398 = vst [vmem:[%s3280_s26 + $0x1e8] sm:$0xff] %v397_v61   ;;  %v405_v63 = vld [vmem:[%s3275_s25 + $0x378] sm:$0xff]  }
  0x31   : > { %402 = vst [vmem:[%s3280_s26 + $0x1f0] sm:$0xff] %v401_v62   ;;  %406 = vst [vmem:[%s3280_s26 + $0x1f8] sm:$0xff] %v405_v63  }
  0x32 PF: > { %p2454_p5 = scmp.ge.s32.totalorder %s3218_s14, 1  ;;  %p686_p6 = scmp.lt.s32.totalorder %s3218_s14, 3 }
  0x34   : > { %p687_p7 = pnand %p2454_p5, %p686_p6 }
  0x36   : > { %690 = sbr.rel (%p687_p7) target bundleno = 428 (0x1ac), region = 69 }
  0x3d   : > { %v3127_v0 = vld [vmem:[%s3914_s1] sm:$0xff]   ;;  %v3128_v1 = vld [vmem:[%s3914_s1 + $0x8] sm:$0xff]   ;;  %vm924_vm0 = vcmask 1044480   ;;  %v3129_v2 = vld [vmem:[%s3914_s1 + $0x10] sm:$0xff]   ;;  %s693_s6 = sand.u32 1, %s3210_s12   ;;  %vm925_vm1 = vcmask 1045504  }
  0x3e   : > { %2934 = vmatprep.subr.bf16.mxu0 %v3127_v0  ;;  %2976 = vmatprep.subr.bf16.mxu1 %v3127_v0  ;;  %v3220_v3 = vmov 65535   ;;  %s2455_s7 = sshll.u32 %s693_s6, 9  ;;  %v3130_v5 = vld [vmem:[%s3914_s1 + $0x18] sm:$0xff]   ;;  %v3131_v6 = vld [vmem:[%s3914_s1 + $0x20] sm:$0x3f]   ;;  %vm875_vm2 = vcmask 613376  }
  0x3f   : > { %2935 = vmatpush3.bf16.msra.mxu0 %v3127_v0  ;;  %2977 = vmatpush3.bf16.msra.mxu1 %v3127_v0  ;;  %v926_v4 = vsel %vm924_vm0, 4294967295, %v3220_v3  ;;  %s3425_s17 = scalar_lea.vmem [#allocation2], %s2455_s7  ;;  %s2456_s12 = sshll.u32 %s2447_s15, 5 }
  0x40   : > { %2936 = vmatprep.subr.bf16.mxu0 %v3128_v1  ;;  %2978 = vmatprep.subr.bf16.mxu1 %v3128_v1  ;;  %v3132_v7 = vld [vmem:[%s3425_s17] sm:$0xff]   ;;  %v927_v8 = vsel %vm925_vm1, %v926_v4, 0  ;;  %v3134_v11 = vld [vmem:[%s3425_s17 + $0x8] sm:$0xff]   ;;  %v3136_v13 = vld [vmem:[%s3425_s17 + $0x10] sm:$0xff]   ;;  %p718_p8 = scmp.lt.s32.totalorder %s2456_s12, 63 }
  0x41   : > { %v3133_v9 = vld [vmem:[%s3425_s17 + $0x80] sm:$0xff]   ;;  %2944 = vmatprep.mubr.msk.bf16.mxu0 %vm875_vm2, %v3132_v7  ;;  %v929_v10 = vand.u32 %v3131_v6, %v927_v8  ;;  %v3135_v12 = vld [vmem:[%s3425_s17 + $0x88] sm:$0xff]   ;;  %v3137_v14 = vld [vmem:[%s3425_s17 + $0x90] sm:$0xff]  }
  0x42   : > { %2986 = vmatprep.mubr.msk.bf16.mxu1 %vm875_vm2, %v3133_v9  ;;  %v3138_v15 = vld [vmem:[%s3425_s17 + $0x18] sm:$0xff]   ;;  %v3140_v17 = vld [vmem:[%s3425_s17 + $0x20] sm:$0xff]   ;;  %v3142_v19 = vld [vmem:[%s3425_s17 + $0x28] sm:$0xff]   ;;  %s4004_s12 = smov (!%p718_p8, %s2456_s12), 63 }
  0x43   : > { %2937 = vmatpush3.bf16.msra.mxu0 %v3128_v1  ;;  %2979 = vmatpush3.bf16.msra.mxu1 %v3128_v1  ;;  %v3139_v16 = vld [vmem:[%s3425_s17 + $0x98] sm:$0xff]   ;;  %v3141_v18 = vld [vmem:[%s3425_s17 + $0xa0] sm:$0xff]   ;;  %v3143_v20 = vld [vmem:[%s3425_s17 + $0xa8] sm:$0xff]   ;;  %s2457_s14 = sshll.u32 %s4004_s12, 2 }
  0x44   : > { %2938 = vmatprep.subr.bf16.mxu0 %v3129_v2  ;;  %2980 = vmatprep.subr.bf16.mxu1 %v3129_v2  ;;  %v3144_v21 = vld [vmem:[%s3425_s17 + $0x30] sm:$0xff]   ;;  %v3146_v23 = vld [vmem:[%s3425_s17 + $0x38] sm:$0xff]   ;;  %v3148_v25 = vld [vmem:[%s3425_s17 + $0x40] sm:$0xff]   ;;  %s3776_s22 = scalar_lea.vmem %s3916_s3, %s2457_s14 }
  0x45   : > { %v3145_v22 = vld [vmem:[%s3425_s17 + $0xb0] sm:$0xff]   ;;  %v3147_v24 = vld [vmem:[%s3425_s17 + $0xb8] sm:$0xff]   ;;  %v3149_v26 = vld [vmem:[%s3425_s17 + $0xc0] sm:$0xff]  }
  0x46   : > { %v3150_v27 = vld [vmem:[%s3425_s17 + $0x48] sm:$0xff]   ;;  %v3152_v29 = vld [vmem:[%s3425_s17 + $0x50] sm:$0xff]   ;;  %v3154_v31 = vld [vmem:[%s3425_s17 + $0x58] sm:$0xff]  }
  0x47   : > { %2939 = vmatpush3.bf16.msra.mxu0 %v3129_v2  ;;  %2981 = vmatpush3.bf16.msra.mxu1 %v3129_v2  ;;  %v3151_v28 = vld [vmem:[%s3425_s17 + $0xc8] sm:$0xff]   ;;  %v3153_v30 = vld [vmem:[%s3425_s17 + $0xd0] sm:$0xff]   ;;  %v3155_v32 = vld [vmem:[%s3425_s17 + $0xd8] sm:$0xff]  }
  0x48   : > { %2940 = vmatprep.subr.bf16.mxu0 %v3130_v5  ;;  %2982 = vmatprep.subr.bf16.mxu1 %v3130_v5  ;;  %v3156_v33 = vld [vmem:[%s3425_s17 + $0x60] sm:$0xff]   ;;  %v3158_v35 = vld [vmem:[%s3425_s17 + $0x68] sm:$0xff]   ;;  %v3160_v37 = vld [vmem:[%s3425_s17 + $0x70] sm:$0xff]  }
  0x49   : > { %v3157_v34 = vld [vmem:[%s3425_s17 + $0xe0] sm:$0xff]   ;;  %v3159_v36 = vld [vmem:[%s3425_s17 + $0xe8] sm:$0xff]   ;;  %v3161_v38 = vld [vmem:[%s3425_s17 + $0xf0] sm:$0xff]  }
  0x4a   : > { %v3162_v39 = vld [vmem:[%s3425_s17 + $0x78] sm:$0xff]   ;;  %v3164_v41 = vld [vmem:[%s3425_s17 + $0x100] sm:$0xff]   ;;  %v3166_v43 = vld [vmem:[%s3425_s17 + $0x108] sm:$0xff]  }
  0x4b   : > { %2941 = vmatpush3.bf16.msra.mxu0 %v3130_v5  ;;  %2983 = vmatpush3.bf16.msra.mxu1 %v3130_v5  ;;  %v3163_v40 = vld [vmem:[%s3425_s17 + $0xf8] sm:$0xff]   ;;  %v3165_v42 = vld [vmem:[%s3425_s17 + $0x180] sm:$0xff]   ;;  %v3167_v44 = vld [vmem:[%s3425_s17 + $0x188] sm:$0xff]  }
  0x4c   : > { %2942 = vmatprep.subr.bf16.mxu0 %v929_v10  ;;  %2984 = vmatprep.subr.bf16.mxu1 %v929_v10  ;;  %v3168_v45 = vld [vmem:[%s3425_s17 + $0x110] sm:$0xff]   ;;  %v3170_v47 = vld [vmem:[%s3425_s17 + $0x118] sm:$0xff]   ;;  %v3172_v49 = vld [vmem:[%s3425_s17 + $0x120] sm:$0xff]  }
  0x4d   : > { %v3169_v46 = vld [vmem:[%s3425_s17 + $0x190] sm:$0xff]   ;;  %v3171_v48 = vld [vmem:[%s3425_s17 + $0x198] sm:$0xff]   ;;  %v3173_v50 = vld [vmem:[%s3425_s17 + $0x1a0] sm:$0xff]  }
  0x4e   : > { %v3174_v51 = vld [vmem:[%s3425_s17 + $0x128] sm:$0xff]   ;;  %v3176_v53 = vld [vmem:[%s3425_s17 + $0x130] sm:$0xff]   ;;  %v3178_v55 = vld [vmem:[%s3425_s17 + $0x138] sm:$0xff]  }
  0x4f   : > { %2943 = vmatpush3.bf16.msra.mxu0 %v929_v10  ;;  %2985 = vmatpush3.bf16.msra.mxu1 %v929_v10  ;;  %v3175_v52 = vld [vmem:[%s3425_s17 + $0x1a8] sm:$0xff]   ;;  %v3177_v54 = vld [vmem:[%s3425_s17 + $0x1b0] sm:$0xff]   ;;  %v3179_v56 = vld [vmem:[%s3425_s17 + $0x1b8] sm:$0xff]  }
  0x50   : > { %3018 = vmatprep.subr.bf16.mxu0 %v3127_v0  ;;  %3060 = vmatprep.subr.bf16.mxu1 %v3127_v0  ;;  %v3180_v57 = vld [vmem:[%s3425_s17 + $0x140] sm:$0xff]   ;;  %v3182_v59 = vld [vmem:[%s3425_s17 + $0x148] sm:$0xff]   ;;  %v3184_v61 = vld [vmem:[%s3425_s17 + $0x150] sm:$0xff]  }
  0x51   : > { %v3181_v58 = vld [vmem:[%s3425_s17 + $0x1c0] sm:$0xff]   ;;  %v3183_v60 = vld [vmem:[%s3425_s17 + $0x1c8] sm:$0xff]   ;;  %v3185_v62 = vld [vmem:[%s3425_s17 + $0x1d0] sm:$0xff]  }
  0x52   : > { %2945 = vmatmul.mubr.msk.bf16.vlgmr.msra.gmra.mrb[0].mxu0 %vm875_vm2, %v3134_v11  ;;  %2987 = vmatmul.mubr.msk.bf16.vlgmr.msra.gmra.mrb[0].mxu1 %vm875_vm2, %v3135_v12  ;;  %v3186_v63 = vld [vmem:[%s3425_s17 + $0x158] sm:$0xff]   ;;  %v3190_v3 = vld [vmem:[%s3425_s17 + $0x168] sm:$0xff]   ;;  %v3193_v6 = vld [vmem:[%s3425_s17 + $0x1f0] sm:$0xff]  }
  0x53   : > { %3019 = vmatpush3.bf16.msra.mxu0 %v3127_v0  ;;  %3061 = vmatpush3.bf16.msra.mxu1 %v3127_v0  ;;  %v3187_v0 = vld [vmem:[%s3425_s17 + $0x1d8] sm:$0xff]   ;;  %v3191_v4 = vld [vmem:[%s3425_s17 + $0x1e8] sm:$0xff]  }
  0x54   : > { %2948 = vmatprep.mubr.msk.bf16.mxu0 %vm875_vm2, %v3136_v13  ;;  %2990 = vmatprep.mubr.msk.bf16.mxu1 %vm875_vm2, %v3137_v14  ;;  %v3194_v7 = vld [vmem:[%s3425_s17 + $0x178] sm:$0xff]  }
  0x55   : > { %3020 = vmatprep.subr.bf16.mxu0 %v3128_v1  ;;  %3062 = vmatprep.subr.bf16.mxu1 %v3128_v1  ;;  %v3195_v8 = vld [vmem:[%s3425_s17 + $0x1f8] sm:$0xff]  }
  0x57   : > { %3021 = vmatpush3.bf16.msra.mxu0 %v3128_v1  ;;  %3063 = vmatpush3.bf16.msra.mxu1 %v3128_v1  ;;  %v3188_v1 = vld [vmem:[%s3425_s17 + $0x160] sm:$0xff]  }
  0x58   : > { %3022 = vmatprep.subr.bf16.mxu0 %v3129_v2  ;;  %3064 = vmatprep.subr.bf16.mxu1 %v3129_v2 }
  0x5a   : > { %2949 = vmatmul.mubr.msk.bf16.gmra.mrb[4].mxu0 %vm875_vm2, %v3138_v15  ;;  %2991 = vmatmul.mubr.msk.bf16.gmra.mrb[4].mxu1 %vm875_vm2, %v3139_v16 }
  0x5b   : > { %2952 = vmatprep.mubr.msk.bf16.mxu0 %vm875_vm2, %v3140_v17  ;;  %2994 = vmatprep.mubr.msk.bf16.mxu1 %vm875_vm2, %v3141_v18 }
  0x5c   : > { %3023 = vmatpush3.bf16.msra.mxu0 %v3129_v2  ;;  %3065 = vmatpush3.bf16.msra.mxu1 %v3129_v2  ;;  %v3189_v2 = vld [vmem:[%s3425_s17 + $0x1e0] sm:$0xff]  }
  0x5d   : > { %3024 = vmatprep.subr.bf16.mxu0 %v3130_v5  ;;  %3066 = vmatprep.subr.bf16.mxu1 %v3130_v5 }
  0x60   : > { %3025 = vmatpush3.bf16.msra.mxu0 %v3130_v5  ;;  %3067 = vmatpush3.bf16.msra.mxu1 %v3130_v5  ;;  %v3192_v5 = vld [vmem:[%s3425_s17 + $0x170] sm:$0xff]  }
  0x61   : > { %3026 = vmatprep.subr.bf16.mxu0 %v929_v10  ;;  %3068 = vmatprep.subr.bf16.mxu1 %v929_v10 }
  0x62   : > { %2953 = vmatmul.mubr.msk.bf16.gmra.mrb[8].mxu0 %vm875_vm2, %v3142_v19  ;;  %2995 = vmatmul.mubr.msk.bf16.gmra.mrb[8].mxu1 %vm875_vm2, %v3143_v20 }
  0x63   : > { %2956 = vmatprep.mubr.msk.bf16.mxu0 %vm875_vm2, %v3144_v21  ;;  %2998 = vmatprep.mubr.msk.bf16.mxu1 %vm875_vm2, %v3145_v22 }
  0x64   : > { %3027 = vmatpush3.bf16.msra.mxu0 %v929_v10  ;;  %3069 = vmatpush3.bf16.msra.mxu1 %v929_v10 }
  0x6a   : > { %2957 = vmatmul.mubr.msk.bf16.gmra.mrb[12].mxu0 %vm875_vm2, %v3146_v23  ;;  %2999 = vmatmul.mubr.msk.bf16.gmra.mrb[12].mxu1 %vm875_vm2, %v3147_v24 }
  0x6b   : > { %2960 = vmatprep.mubr.msk.bf16.mxu0 %vm875_vm2, %v3148_v25  ;;  %3002 = vmatprep.mubr.msk.bf16.mxu1 %vm875_vm2, %v3149_v26 }
  0x72   : > { %2961 = vmatmul.mubr.msk.bf16.gmra.mrb[16].mxu0 %vm875_vm2, %v3150_v27  ;;  %3003 = vmatmul.mubr.msk.bf16.gmra.mrb[16].mxu1 %vm875_vm2, %v3151_v28 }
  0x73   : > { %2964 = vmatprep.mubr.msk.bf16.mxu0 %vm875_vm2, %v3152_v29  ;;  %3006 = vmatprep.mubr.msk.bf16.mxu1 %vm875_vm2, %v3153_v30 }
  0x7a   : > { %2965 = vmatmul.mubr.msk.bf16.gmra.mrb[20].mxu0 %vm875_vm2, %v3154_v31  ;;  %3007 = vmatmul.mubr.msk.bf16.gmra.mrb[20].mxu1 %vm875_vm2, %v3155_v32 }
  0x7b   : > { %2968 = vmatprep.mubr.msk.bf16.mxu0 %vm875_vm2, %v3156_v33  ;;  %3010 = vmatprep.mubr.msk.bf16.mxu1 %vm875_vm2, %v3157_v34 }
  0x82   : > { %2969 = vmatmul.mubr.msk.bf16.gmra.mrb[24].mxu0 %vm875_vm2, %v3158_v35  ;;  %3011 = vmatmul.mubr.msk.bf16.gmra.mrb[24].mxu1 %vm875_vm2, %v3159_v36 }
  0x83   : > { %2972 = vmatprep.mubr.msk.bf16.mxu0 %vm875_vm2, %v3160_v37  ;;  %3014 = vmatprep.mubr.msk.bf16.mxu1 %vm875_vm2, %v3161_v38 }
  0x8a   : > { %2973 = vmatmul.mubr.msk.bf16.gmra.mrb[28].mxu0 %vm875_vm2, %v3162_v39  ;;  %3015 = vmatmul.mubr.msk.bf16.gmra.mrb[28].mxu1 %vm875_vm2, %v3163_v40 }
  0x8b   : > { %3028 = vmatprep.mubr.msk.bf16.mxu0 %vm875_vm2, %v3164_v41  ;;  %3070 = vmatprep.mubr.msk.bf16.mxu1 %vm875_vm2, %v3165_v42 }
  0x92   : > { %3029 = vmatmul.mubr.msk.bf16.vlgmr.msra.gmra.mrb[32].mxu0 %vm875_vm2, %v3166_v43  ;;  %3071 = vmatmul.mubr.msk.bf16.vlgmr.msra.gmra.mrb[32].mxu1 %vm875_vm2, %v3167_v44 }
  0x93   : > { %3032 = vmatprep.mubr.msk.bf16.mxu0 %vm875_vm2, %v3168_v45  ;;  %3074 = vmatprep.mubr.msk.bf16.mxu1 %vm875_vm2, %v3169_v46 }
  0x9a   : > { %3033 = vmatmul.mubr.msk.bf16.gmra.mrb[36].mxu0 %vm875_vm2, %v3170_v47  ;;  %3075 = vmatmul.mubr.msk.bf16.gmra.mrb[36].mxu1 %vm875_vm2, %v3171_v48 }
  0x9b   : > { %3036 = vmatprep.mubr.msk.bf16.mxu0 %vm875_vm2, %v3172_v49  ;;  %3078 = vmatprep.mubr.msk.bf16.mxu1 %vm875_vm2, %v3173_v50 }
  0xa2   : > { %3037 = vmatmul.mubr.msk.bf16.gmra.mrb[40].mxu0 %vm875_vm2, %v3174_v51  ;;  %3079 = vmatmul.mubr.msk.bf16.gmra.mrb[40].mxu1 %vm875_vm2, %v3175_v52 }
  0xa3   : > { %3040 = vmatprep.mubr.msk.bf16.mxu0 %vm875_vm2, %v3176_v53  ;;  %3082 = vmatprep.mubr.msk.bf16.mxu1 %vm875_vm2, %v3177_v54 }
  0xaa   : > { %3041 = vmatmul.mubr.msk.bf16.gmra.mrb[44].mxu0 %vm875_vm2, %v3178_v55  ;;  %3083 = vmatmul.mubr.msk.bf16.gmra.mrb[44].mxu1 %vm875_vm2, %v3179_v56 }
  0xab   : > { %3044 = vmatprep.mubr.msk.bf16.mxu0 %vm875_vm2, %v3180_v57  ;;  %3086 = vmatprep.mubr.msk.bf16.mxu1 %vm875_vm2, %v3181_v58 }
  0xb2   : > { %3045 = vmatmul.mubr.msk.bf16.gmra.mrb[48].mxu0 %vm875_vm2, %v3182_v59  ;;  %3087 = vmatmul.mubr.msk.bf16.gmra.mrb[48].mxu1 %vm875_vm2, %v3183_v60 }
  0xb3   : > { %3048 = vmatprep.mubr.msk.bf16.mxu0 %vm875_vm2, %v3184_v61  ;;  %3090 = vmatprep.mubr.msk.bf16.mxu1 %vm875_vm2, %v3185_v62 }
  0xba   : > { %3049 = vmatmul.mubr.msk.bf16.gmra.mrb[52].mxu0 %vm875_vm2, %v3186_v63  ;;  %3091 = vmatmul.mubr.msk.bf16.gmra.mrb[52].mxu1 %vm875_vm2, %v3187_v0 }
  0xbb   : > { %3052 = vmatprep.mubr.msk.bf16.mxu0 %vm875_vm2, %v3188_v1  ;;  %3094 = vmatprep.mubr.msk.bf16.mxu1 %vm875_vm2, %v3189_v2  ;;  %v3755_v1 = vld [vmem:[%s3915_s2] ss:$0 sm:$0xff] }
  0xc2   : > { %3053 = vmatmul.mubr.msk.bf16.gmra.mrb[56].mxu0 %vm875_vm2, %v3190_v3  ;;  %3095 = vmatmul.mubr.msk.bf16.gmra.mrb[56].mxu1 %vm875_vm2, %v3191_v4 }
  0xc3   : > { %3056 = vmatprep.mubr.msk.bf16.mxu0 %vm875_vm2, %v3192_v5  ;;  %3098 = vmatprep.mubr.msk.bf16.mxu1 %vm875_vm2, %v3193_v6 }
  0xca   : > { %3057 = vmatmul.mubr.msk.bf16.gmra.mrb[60].mxu0 %vm875_vm2, %v3194_v7  ;;  %3099 = vmatmul.mubr.msk.bf16.gmra.mrb[60].mxu1 %vm875_vm2, %v3195_v8 }
 0x125   : > { %v3555_v9 = vpop.f32.mrb[0].mxu0  ;;  %v3557_v10 = vpop.f32.mrb[0].mxu1 }
 0x126   : > { %v3561_v12 = vpop.f32.mrb[1].mxu0  ;;  %v3563_v13 = vpop.f32.mrb[1].mxu1  ;;  %v3951_v7 = vmax.f32 %v3555_v9, %v3557_v10 }
 0x127   : > { %v3567_v15 = vpop.f32.mrb[2].mxu0  ;;  %v3569_v16 = vpop.f32.mrb[2].mxu1 }
 0x128   : > { %v3573_v18 = vpop.f32.mrb[3].mxu0  ;;  %v3575_v19 = vpop.f32.mrb[3].mxu1 }
 0x12d   : > { %v3579_v21 = vpop.f32.mrb[4].mxu0  ;;  %v3581_v22 = vpop.f32.mrb[4].mxu1 }
 0x12e   : > { %v3585_v24 = vpop.f32.mrb[5].mxu0  ;;  %v3587_v25 = vpop.f32.mrb[5].mxu1 }
 0x12f   : > { %v3591_v27 = vpop.f32.mrb[6].mxu0  ;;  %v3593_v28 = vpop.f32.mrb[6].mxu1 }
 0x130   : > { %v3597_v30 = vpop.f32.mrb[7].mxu0  ;;  %v3599_v31 = vpop.f32.mrb[7].mxu1 }
 0x135   : > { %v3603_v33 = vpop.f32.mrb[8].mxu0  ;;  %v3605_v34 = vpop.f32.mrb[8].mxu1 }
 0x136   : > { %v3609_v36 = vpop.f32.mrb[9].mxu0  ;;  %v3611_v37 = vpop.f32.mrb[9].mxu1 }
 0x137   : > { %v3615_v39 = vpop.f32.mrb[10].mxu0  ;;  %v3617_v40 = vpop.f32.mrb[10].mxu1 }
 0x138   : > { %v3621_v42 = vpop.f32.mrb[11].mxu0  ;;  %v3623_v43 = vpop.f32.mrb[11].mxu1 }
 0x13d   : > { %v3627_v45 = vpop.f32.mrb[12].mxu0  ;;  %v3629_v46 = vpop.f32.mrb[12].mxu1 }
 0x13e   : > { %v3633_v48 = vpop.f32.mrb[13].mxu0  ;;  %v3635_v49 = vpop.f32.mrb[13].mxu1 }
 0x13f   : > { %v3639_v51 = vpop.f32.mrb[14].mxu0  ;;  %v3641_v52 = vpop.f32.mrb[14].mxu1 }
 0x140   : > { %v3645_v54 = vpop.f32.mrb[15].mxu0  ;;  %v3647_v55 = vpop.f32.mrb[15].mxu1 }
 0x145   : > { %v3651_v57 = vpop.f32.mrb[16].mxu0  ;;  %v3653_v58 = vpop.f32.mrb[16].mxu1 }
 0x146   : > { %v3657_v60 = vpop.f32.mrb[17].mxu0  ;;  %v3659_v61 = vpop.f32.mrb[17].mxu1 }
 0x147   : > { %v3663_v63 = vpop.f32.mrb[18].mxu0  ;;  %v3665_v0 = vpop.f32.mrb[18].mxu1 }
 0x148   : > { %v3669_v2 = vpop.f32.mrb[19].mxu0  ;;  %v3671_v3 = vpop.f32.mrb[19].mxu1 }
 0x14d   : > { %v3675_v5 = vpop.f32.mrb[20].mxu0  ;;  %v3677_v6 = vpop.f32.mrb[20].mxu1 }
 0x14e   : > { %v3681_v8 = vpop.f32.mrb[21].mxu0  ;;  %v3683_v62 = vpop.f32.mrb[21].mxu1 }
 0x14f   : > { %v3687_v59 = vpop.f32.mrb[22].mxu0  ;;  %v3689_v56 = vpop.f32.mrb[22].mxu1 }
 0x150   : > { %v3693_v53 = vpop.f32.mrb[23].mxu0  ;;  %v3695_v50 = vpop.f32.mrb[23].mxu1 }
 0x151   : > { %3934 = vst [vmem:[#allocation3_spill] sm:$0xff] %v3695_v50 }
 0x155   : > { %v3699_v47 = vpop.f32.mrb[24].mxu0  ;;  %v3701_v44 = vpop.f32.mrb[24].mxu1 }
 0x156   : > { %3935 = vst [vmem:[#allocation4_spill] sm:$0xff] %v3699_v47  ;;  %3936 = vst [vmem:[#allocation5_spill] sm:$0xff] %v3701_v44  ;;  %v3705_v41 = vpop.f32.mrb[25].mxu0  ;;  %v3707_v38 = vpop.f32.mrb[25].mxu1 }
 0x157   : > { %3937 = vst [vmem:[#allocation6_spill] sm:$0xff] %v3705_v41  ;;  %3938 = vst [vmem:[#allocation7_spill] sm:$0xff] %v3707_v38  ;;  %v3711_v35 = vpop.f32.mrb[26].mxu0  ;;  %v3713_v32 = vpop.f32.mrb[26].mxu1  ;;  %v3953_v38 = vmax.f32 %v3567_v15, %v3569_v16 }
 0x158   : > { %3939 = vst [vmem:[#allocation8_spill] sm:$0xff] %v3711_v35  ;;  %3940 = vst [vmem:[#allocation9_spill] sm:$0xff] %v3713_v32  ;;  %v3717_v29 = vpop.f32.mrb[27].mxu0  ;;  %v3719_v26 = vpop.f32.mrb[27].mxu1 }
 0x159   : > { %3941 = vst [vmem:[#allocation10_spill] sm:$0xff] %v3717_v29  ;;  %3942 = vst [vmem:[#allocation11_spill] sm:$0xff] %v3719_v26 }
 0x15d   : > { %v3723_v23 = vpop.f32.mrb[28].mxu0  ;;  %v3725_v20 = vpop.f32.mrb[28].mxu1 }
 0x15e   : > { %3943 = vst [vmem:[#allocation12_spill] sm:$0xff] %v3723_v23  ;;  %3944 = vst [vmem:[#allocation13_spill] sm:$0xff] %v3725_v20  ;;  %v3729_v17 = vpop.f32.mrb[29].mxu0  ;;  %v3731_v14 = vpop.f32.mrb[29].mxu1 }
 0x15f   : > { %3945 = vst [vmem:[#allocation14_spill] sm:$0xff] %v3729_v17  ;;  %3946 = vst [vmem:[#allocation15_spill] sm:$0xff] %v3731_v14  ;;  %v3735_v11 = vpop.f32.mrb[30].mxu0  ;;  %v3737_v32 = vpop.f32.mrb[30].mxu1 }
 0x160   : > { %3947 = vst [vmem:[#allocation16_spill] sm:$0xff] %v3735_v11  ;;  %3948 = vst [vmem:[#allocation17_spill] sm:$0xff] %v3737_v32  ;;  %v3741_v26 = vpop.f32.mrb[31].mxu0  ;;  %v3743_v29 = vpop.f32.mrb[31].mxu1  ;;  %v3952_v32 = vmax.f32 %v3561_v12, %v3563_v13 }
 0x161   : > { %3949 = vst [vmem:[#allocation18_spill] sm:$0xff] %v3741_v26  ;;  %3950 = vst [vmem:[#allocation19_spill] sm:$0xff] %v3743_v29 }
 0x165   : > { %v3030_v20 = vpop.f32.mrb[32].mxu0  ;;  %v3072_v23 = vpop.f32.mrb[32].mxu1 }
 0x166   : > { %v1770_v14 = vmax.f32 %v3951_v7, %v3030_v20  ;;  %v1641_v17 = vpop.f32.mrb[33].mxu0  ;;  %v1995_v35 = vpop.f32.mrb[33].mxu1  ;;  %v3954_v7 = vmax.f32 %v3573_v18, %v3575_v19 }
 0x167   : > { %v1768_v4 = vmax.f32 %v3952_v32, %v1641_v17  ;;  %v3031_v29 = vpop.f32.mrb[34].mxu0  ;;  %v3073_v26 = vpop.f32.mrb[34].mxu1  ;;  %v3955_v32 = vmax.f32 %v3579_v21, %v3581_v22  ;;  %v3957_v22 = vmax.f32 %v3591_v27, %v3593_v28 }
 0x168   : > { %v2124_v11 = vmax.f32 %v1770_v14, %v3072_v23  ;;  %v1771_v41 = vmax.f32 %v3953_v38, %v3031_v29  ;;  %v1644_v9 = vpop.f32.mrb[35].mxu0  ;;  %v1998_v10 = vpop.f32.mrb[35].mxu1  ;;  %v3956_v38 = vmax.f32 %v3585_v24, %v3587_v25 }
 0x169   : > { %v2122_v20 = vmax.f32 %v1768_v4, %v1995_v35  ;;  %v1769_v44 = vmax.f32 %v3954_v7, %v1644_v9 }
 0x16a   : > { %v2163_v47 = vadd.f32 %v3755_v1, %v2124_v11  ;;  %v2125_v50 = vmax.f32 %v1771_v41, %v3073_v26 }
 0x16b   : > { %v2161_v12 = vadd.f32 %v3755_v1, %v2122_v20  ;;  %v2123_v13 = vmax.f32 %v1769_v44, %v1998_v10 }
 0x16c   : > { %v2164_v14 = vadd.f32 %v3755_v1, %v2125_v50  ;;  %v2195_v23 = vmax.f32 %v2163_v47, 0.0 }
 0x16d   : > { %v2162_v15 = vadd.f32 %v3755_v1, %v2123_v13  ;;  %v3034_v16 = vpop.f32.mrb[36].mxu0  ;;  %v3076_v17 = vpop.f32.mrb[36].mxu1  ;;  %v2193_v11 = vmax.f32 %v2161_v12, 0.0  ;;  %v3958_v12 = vmax.f32 %v3597_v30, %v3599_v31  ;;  %v3959_v30 = vmax.f32 %v3603_v33, %v3605_v34 }
 0x16e   : > { %v2196_v29 = vmax.f32 %v2164_v14, 0.0  ;;  %v1774_v18 = vmax.f32 %v3955_v32, %v3034_v16  ;;  %v1657_v19 = vpop.f32.mrb[37].mxu0  ;;  %v2011_v35 = vpop.f32.mrb[37].mxu1 }
 0x16f   : > { %v2194_v26 = vmax.f32 %v2162_v15, 0.0  ;;  %v1772_v41 = vmax.f32 %v3956_v38, %v1657_v19  ;;  %v3035_v44 = vpop.f32.mrb[38].mxu0  ;;  %v3077_v47 = vpop.f32.mrb[38].mxu1 }
 0x170   : > { %v2763_v50 = vpack.c.bf16 %v2196_v29, %v2195_v23  ;;  %v2128_v21 = vmax.f32 %v1774_v18, %v3076_v17  ;;  %v1775_v4 = vmax.f32 %v3957_v22, %v3035_v44  ;;  %v1660_v9 = vpop.f32.mrb[39].mxu0  ;;  %v2014_v10 = vpop.f32.mrb[39].mxu1 }
 0x171   : > { %v2758_v20 = vpack.c.bf16 %v2194_v26, %v2193_v11  ;;  %v2126_v7 = vmax.f32 %v1772_v41, %v2011_v35  ;;  %v1773_v13 = vmax.f32 %v3958_v12, %v1660_v9  ;;  %v3960_v11 = vmax.f32 %v3609_v36, %v3611_v37 }
 0x172   : > { %2835 = vst [vmem:[%s3776_s22 + $0x8] sm:$0xff] %v2763_v50   ;;  %v2167_v24 = vadd.f32 %v3755_v1, %v2128_v21  ;;  %v2129_v25 = vmax.f32 %v1775_v4, %v3077_v47  ;;  %v3961_v50 = vmax.f32 %v3615_v39, %v3617_v40  ;;  %v3962_v9 = vmax.f32 %v3621_v42, %v3623_v43 }
 0x173   : > { %2759 = vst [vmem:[%s3776_s22] sm:$0xff] %v2758_v20   ;;  %v2165_v14 = vadd.f32 %v3755_v1, %v2126_v7  ;;  %v2127_v15 = vmax.f32 %v1773_v13, %v2014_v10  ;;  %v3963_v42 = vmax.f32 %v3627_v45, %v3629_v46 }
 0x174   : > { %v2168_v16 = vadd.f32 %v3755_v1, %v2129_v25  ;;  %v2199_v23 = vmax.f32 %v2167_v24, 0.0 }
 0x175   : > { %v2166_v27 = vadd.f32 %v3755_v1, %v2127_v15  ;;  %v3038_v28 = vpop.f32.mrb[40].mxu0  ;;  %v3080_v17 = vpop.f32.mrb[40].mxu1  ;;  %v2197_v19 = vmax.f32 %v2165_v14, 0.0 }
 0x176   : > { %v2200_v29 = vmax.f32 %v2168_v16, 0.0  ;;  %v1778_v31 = vmax.f32 %v3959_v30, %v3038_v28  ;;  %v1673_v32 = vpop.f32.mrb[41].mxu0  ;;  %v2027_v18 = vpop.f32.mrb[41].mxu1  ;;  %v3964_v28 = vmax.f32 %v3633_v48, %v3635_v49 }
 0x177   : > { %v2198_v35 = vmax.f32 %v2166_v27, 0.0  ;;  %v1776_v26 = vmax.f32 %v3960_v11, %v1673_v32  ;;  %v3039_v38 = vpop.f32.mrb[42].mxu0  ;;  %v3081_v41 = vpop.f32.mrb[42].mxu1  ;;  %v3965_v32 = vmax.f32 %v3639_v51, %v3641_v52  ;;  %v3966_v11 = vmax.f32 %v3645_v54, %v3647_v55 }
 0x178   : > { %v2773_v44 = vpack.c.bf16 %v2200_v29, %v2199_v23  ;;  %v2132_v47 = vmax.f32 %v1778_v31, %v3080_v17  ;;  %v1779_v21 = vmax.f32 %v3961_v50, %v3039_v38  ;;  %v1676_v33 = vpop.f32.mrb[43].mxu0  ;;  %v2030_v34 = vpop.f32.mrb[43].mxu1  ;;  %v3967_v54 = vmax.f32 %v3651_v57, %v3653_v58 }
 0x179   : > { %v2768_v22 = vpack.c.bf16 %v2198_v35, %v2197_v19  ;;  %v2130_v4 = vmax.f32 %v1776_v26, %v2027_v18  ;;  %v1777_v10 = vmax.f32 %v3962_v9, %v1676_v33  ;;  %v3968_v9 = vmax.f32 %v3657_v60, %v3659_v61 }
 0x17a   : > { %2837 = vst [vmem:[%s3776_s22 + $0x18] sm:$0xff] %v2773_v44   ;;  %v2171_v36 = vadd.f32 %v3755_v1, %v2132_v47  ;;  %v2133_v37 = vmax.f32 %v1779_v21, %v3081_v41 }
 0x17b   : > { %2836 = vst [vmem:[%s3776_s22 + $0x10] sm:$0xff] %v2768_v22   ;;  %v2169_v20 = vadd.f32 %v3755_v1, %v2130_v4  ;;  %v2131_v7 = vmax.f32 %v1777_v10, %v2030_v34 }
 0x17c   : > { %v2172_v12 = vadd.f32 %v3755_v1, %v2133_v37  ;;  %v2203_v24 = vmax.f32 %v2171_v36, 0.0 }
 0x17d   : > { %v2170_v39 = vadd.f32 %v3755_v1, %v2131_v7  ;;  %v3042_v40 = vpop.f32.mrb[44].mxu0  ;;  %v3084_v13 = vpop.f32.mrb[44].mxu1  ;;  %v2201_v16 = vmax.f32 %v2169_v20, 0.0 }
 0x17e   : > { %v2204_v25 = vmax.f32 %v2172_v12, 0.0  ;;  %v1782_v43 = vmax.f32 %v3963_v42, %v3042_v40  ;;  %v1689_v14 = vpop.f32.mrb[45].mxu0  ;;  %v2043_v15 = vpop.f32.mrb[45].mxu1  ;;  %v3969_v12 = vmax.f32 %v3663_v63, %v3665_v0 }
 0x17f   : > { %v2202_v27 = vmax.f32 %v2170_v39, 0.0  ;;  %v1780_v17 = vmax.f32 %v3964_v28, %v1689_v14  ;;  %v3043_v23 = vpop.f32.mrb[46].mxu0  ;;  %v3085_v29 = vpop.f32.mrb[46].mxu1 }
 0x180   : > { %v2783_v30 = vpack.c.bf16 %v2204_v25, %v2203_v24  ;;  %v2136_v31 = vmax.f32 %v1782_v43, %v3084_v13  ;;  %v1783_v18 = vmax.f32 %v3965_v32, %v3043_v23  ;;  %v1692_v45 = vpop.f32.mrb[47].mxu0  ;;  %v2046_v46 = vpop.f32.mrb[47].mxu1  ;;  %v3970_v24 = vmax.f32 %v3669_v2, %v3671_v3 }
 0x181   : > { %v2778_v19 = vpack.c.bf16 %v2202_v27, %v2201_v16  ;;  %v2134_v35 = vmax.f32 %v1780_v17, %v2043_v15  ;;  %v1781_v26 = vmax.f32 %v3966_v11, %v1692_v45  ;;  %v3971_v2 = vmax.f32 %v3675_v5, %v3677_v6 }
 0x182   : > { %2839 = vst [vmem:[%s3776_s22 + $0x28] sm:$0xff] %v2783_v30   ;;  %v2175_v48 = vadd.f32 %v3755_v1, %v2136_v31  ;;  %v2137_v49 = vmax.f32 %v1783_v18, %v3085_v29  ;;  %v3972_v30 = vmax.f32 %v3681_v8, %v3683_v62 }
 0x183   : > { %2838 = vst [vmem:[%s3776_s22 + $0x20] sm:$0xff] %v2778_v19   ;;  %v2173_v38 = vadd.f32 %v3755_v1, %v2134_v35  ;;  %v2135_v41 = vmax.f32 %v1781_v26, %v2046_v46  ;;  %v3973_v19 = vmax.f32 %v3687_v59, %v3689_v56 }
 0x184   : > { %v2176_v44 = vadd.f32 %v3755_v1, %v2137_v49  ;;  %v2207_v50 = vmax.f32 %v2175_v48, 0.0  ;;  %v3974_v48 = vld [vmem:[#allocation3_spill] sm:$0xff] }
 0x185   : > { %v2174_v51 = vadd.f32 %v3755_v1, %v2135_v41  ;;  %v3046_v52 = vpop.f32.mrb[48].mxu0  ;;  %v3088_v47 = vpop.f32.mrb[48].mxu1  ;;  %v2205_v22 = vmax.f32 %v2173_v38, 0.0  ;;  %v3975_v49 = vmax.f32 %v3693_v53, %v3974_v48 }
 0x186   : > { %v2208_v21 = vmax.f32 %v2176_v44, 0.0  ;;  %v1786_v55 = vmax.f32 %v3967_v54, %v3046_v52  ;;  %v1705_v33 = vpop.f32.mrb[49].mxu0  ;;  %v2059_v34 = vpop.f32.mrb[49].mxu1  ;;  %v3977_v54 = vld [vmem:[#allocation5_spill] sm:$0xff] }
 0x187   : > { %v2206_v4 = vmax.f32 %v2174_v51, 0.0  ;;  %v1784_v10 = vmax.f32 %v3968_v9, %v1705_v33  ;;  %v3047_v36 = vpop.f32.mrb[50].mxu0  ;;  %v3089_v37 = vpop.f32.mrb[50].mxu1  ;;  %v3979_v9 = vld [vmem:[#allocation6_spill] sm:$0xff] }
 0x188   : > { %v2793_v20 = vpack.c.bf16 %v2208_v21, %v2207_v50  ;;  %v2140_v7 = vmax.f32 %v1786_v55, %v3088_v47  ;;  %v1787_v39 = vmax.f32 %v3969_v12, %v3047_v36  ;;  %v1708_v57 = vpop.f32.mrb[51].mxu0  ;;  %v2062_v58 = vpop.f32.mrb[51].mxu1  ;;  %v3976_v21 = vld [vmem:[#allocation4_spill] sm:$0xff] }
 0x189   : > { %v2788_v40 = vpack.c.bf16 %v2206_v4, %v2205_v22  ;;  %v2138_v13 = vmax.f32 %v1784_v10, %v2059_v34  ;;  %v1785_v25 = vmax.f32 %v3970_v24, %v1708_v57  ;;  %v3978_v53 = vmax.f32 %v3976_v21, %v3977_v54  ;;  %v3980_v10 = vld [vmem:[#allocation7_spill] sm:$0xff]  ;;  %v3982_v57 = vld [vmem:[#allocation8_spill] sm:$0xff] }
 0x18a   : > { %2841 = vst [vmem:[%s3776_s22 + $0x38] sm:$0xff] %v2793_v20   ;;  %v2179_v60 = vadd.f32 %v3755_v1, %v2140_v7  ;;  %v2141_v61 = vmax.f32 %v1787_v39, %v3089_v37  ;;  %v3981_v36 = vmax.f32 %v3979_v9, %v3980_v10  ;;  %v3998_v21 = vld [vmem:[#allocation19_spill] sm:$0xff] }
 0x18b   : > { %2840 = vst [vmem:[%s3776_s22 + $0x30] sm:$0xff] %v2788_v40   ;;  %v2177_v42 = vadd.f32 %v3755_v1, %v2138_v13  ;;  %v2139_v43 = vmax.f32 %v1785_v25, %v2062_v58  ;;  %v3983_v58 = vld [vmem:[#allocation9_spill] sm:$0xff] }
 0x18c   : > { %v2180_v14 = vadd.f32 %v3755_v1, %v2141_v61  ;;  %v2211_v16 = vmax.f32 %v2179_v60, 0.0  ;;  %v3984_v40 = vmax.f32 %v3982_v57, %v3983_v58 }
 0x18d   : > { %v2178_v63 = vadd.f32 %v3755_v1, %v2139_v43  ;;  %v3050_v0 = vpop.f32.mrb[52].mxu0  ;;  %v3092_v15 = vpop.f32.mrb[52].mxu1  ;;  %v2209_v23 = vmax.f32 %v2177_v42, 0.0  ;;  %v3985_v42 = vld [vmem:[#allocation10_spill] sm:$0xff]  ;;  %v3986_v43 = vld [vmem:[#allocation11_spill] sm:$0xff] }
 0x18e   : > { %v2212_v27 = vmax.f32 %v2180_v14, 0.0  ;;  %v1790_v3 = vmax.f32 %v3971_v2, %v3050_v0  ;;  %v1721_v28 = vpop.f32.mrb[53].mxu0  ;;  %v2075_v17 = vpop.f32.mrb[53].mxu1  ;;  %v3987_v14 = vmax.f32 %v3985_v42, %v3986_v43 }
 0x18f   : > { %v2210_v29 = vmax.f32 %v2178_v63, 0.0  ;;  %v1788_v31 = vmax.f32 %v3972_v30, %v1721_v28  ;;  %v3051_v32 = vpop.f32.mrb[54].mxu0  ;;  %v3093_v18 = vpop.f32.mrb[54].mxu1  ;;  %v3988_v30 = vld [vmem:[#allocation12_spill] sm:$0xff] }
 0x190   : > { %v2803_v45 = vpack.c.bf16 %v2212_v27, %v2211_v16  ;;  %v2144_v46 = vmax.f32 %v1790_v3, %v3092_v15  ;;  %v1791_v35 = vmax.f32 %v3973_v19, %v3051_v32  ;;  %v1724_v5 = vpop.f32.mrb[55].mxu0  ;;  %v2078_v6 = vpop.f32.mrb[55].mxu1 }
 0x191   : > { %v2798_v11 = vpack.c.bf16 %v2210_v29, %v2209_v23  ;;  %v2142_v26 = vmax.f32 %v1788_v31, %v2075_v17  ;;  %v1789_v38 = vmax.f32 %v3975_v49, %v1724_v5  ;;  %v3989_v31 = vld [vmem:[#allocation13_spill] sm:$0xff]  ;;  %v3991_v5 = vld [vmem:[#allocation14_spill] sm:$0xff] }
 0x192   : > { %2843 = vst [vmem:[%s3776_s22 + $0x48] sm:$0xff] %v2803_v45   ;;  %v2183_v62 = vadd.f32 %v3755_v1, %v2144_v46  ;;  %v2145_v8 = vmax.f32 %v1791_v35, %v3093_v18  ;;  %v3990_v32 = vmax.f32 %v3988_v30, %v3989_v31 }
 0x193   : > { %2842 = vst [vmem:[%s3776_s22 + $0x40] sm:$0xff] %v2798_v11   ;;  %v2181_v41 = vadd.f32 %v3755_v1, %v2142_v26  ;;  %v2143_v44 = vmax.f32 %v1789_v38, %v2078_v6  ;;  %v3992_v6 = vld [vmem:[#allocation15_spill] sm:$0xff] }
 0x194   : > { %v2184_v51 = vadd.f32 %v3755_v1, %v2145_v8  ;;  %v2215_v47 = vmax.f32 %v2183_v62, 0.0  ;;  %v3993_v11 = vmax.f32 %v3991_v5, %v3992_v6  ;;  %v3994_v8 = vld [vmem:[#allocation16_spill] sm:$0xff] }
 0x195   : > { %v2182_v56 = vadd.f32 %v3755_v1, %v2143_v44  ;;  %v3054_v59 = vpop.f32.mrb[56].mxu0  ;;  %v3096_v52 = vpop.f32.mrb[56].mxu1  ;;  %v2213_v22 = vmax.f32 %v2181_v41, 0.0  ;;  %v3995_v41 = vld [vmem:[#allocation17_spill] sm:$0xff] }
 0x196   : > { %v2216_v50 = vmax.f32 %v2184_v51, 0.0  ;;  %v1794_v55 = vmax.f32 %v3978_v53, %v3054_v59  ;;  %v1737_v33 = vpop.f32.mrb[57].mxu0  ;;  %v2091_v34 = vpop.f32.mrb[57].mxu1  ;;  %v3996_v44 = vmax.f32 %v3994_v8, %v3995_v41 }
 0x197   : > { %v2214_v4 = vmax.f32 %v2182_v56, 0.0  ;;  %v1792_v37 = vmax.f32 %v3981_v36, %v1737_v33  ;;  %v3055_v20 = vpop.f32.mrb[58].mxu0  ;;  %v3097_v7 = vpop.f32.mrb[58].mxu1 }
 0x198   : > { %v2813_v12 = vpack.c.bf16 %v2216_v50, %v2215_v47  ;;  %v2148_v39 = vmax.f32 %v1794_v55, %v3096_v52  ;;  %v1795_v13 = vmax.f32 %v3984_v40, %v3055_v20  ;;  %v1740_v24 = vpop.f32.mrb[59].mxu0  ;;  %v2094_v25 = vpop.f32.mrb[59].mxu1  ;;  %v3997_v50 = vld [vmem:[#allocation18_spill] sm:$0xff] }
 0x199   : > { %v2808_v60 = vpack.c.bf16 %v2214_v4, %v2213_v22  ;;  %v2146_v61 = vmax.f32 %v1792_v37, %v2091_v34  ;;  %v1793_v63 = vmax.f32 %v3987_v14, %v1740_v24  ;;  %v3999_v54 = vmax.f32 %v3997_v50, %v3998_v21 }
 0x19a   : > { %2845 = vst [vmem:[%s3776_s22 + $0x58] sm:$0xff] %v2813_v12   ;;  %v2187_v0 = vadd.f32 %v3755_v1, %v2148_v39  ;;  %v2149_v15 = vmax.f32 %v1795_v13, %v3097_v7 }
 0x19b   : > { %2844 = vst [vmem:[%s3776_s22 + $0x50] sm:$0xff] %v2808_v60   ;;  %v2185_v16 = vadd.f32 %v3755_v1, %v2146_v61  ;;  %v2147_v27 = vmax.f32 %v1793_v63, %v2094_v25 }
 0x19c   : > { %v2188_v2 = vadd.f32 %v3755_v1, %v2149_v15  ;;  %v2219_v23 = vmax.f32 %v2187_v0, 0.0 }
 0x19d   : > { %v2186_v3 = vadd.f32 %v3755_v1, %v2147_v27  ;;  %v3058_v28 = vpop.f32.mrb[60].mxu0  ;;  %v3100_v17 = vpop.f32.mrb[60].mxu1  ;;  %v2217_v19 = vmax.f32 %v2185_v16, 0.0 }
 0x19e   : > { %v2220_v29 = vmax.f32 %v2188_v2, 0.0  ;;  %v1798_v18 = vmax.f32 %v3990_v32, %v3058_v28  ;;  %v1753_v45 = vpop.f32.mrb[61].mxu0  ;;  %v2107_v46 = vpop.f32.mrb[61].mxu1 }
 0x19f   : > { %v2218_v35 = vmax.f32 %v2186_v3, 0.0  ;;  %v1796_v26 = vmax.f32 %v3993_v11, %v1753_v45  ;;  %v3059_v48 = vpop.f32.mrb[62].mxu0  ;;  %v3101_v49 = vpop.f32.mrb[62].mxu1 }
 0x1a0   : > { %v2823_v38 = vpack.c.bf16 %v2220_v29, %v2219_v23  ;;  %v2152_v62 = vmax.f32 %v1798_v18, %v3100_v17  ;;  %v1799_v51 = vmax.f32 %v3996_v44, %v3059_v48  ;;  %v1756_v56 = vpop.f32.mrb[63].mxu0  ;;  %v2110_v59 = vpop.f32.mrb[63].mxu1 }
 0x1a1   : > { %v2818_v52 = vpack.c.bf16 %v2218_v35, %v2217_v19  ;;  %v2150_v47 = vmax.f32 %v1796_v26, %v2107_v46  ;;  %v1797_v53 = vmax.f32 %v3999_v54, %v1756_v56 }
 0x1a2   : > { %2847 = vst [vmem:[%s3776_s22 + $0x68] sm:$0xff] %v2823_v38   ;;  %v2191_v55 = vadd.f32 %v3755_v1, %v2152_v62  ;;  %v2153_v33 = vmax.f32 %v1799_v51, %v3101_v49 }
 0x1a3   : > { %2846 = vst [vmem:[%s3776_s22 + $0x60] sm:$0xff] %v2818_v52   ;;  %v2189_v34 = vadd.f32 %v3755_v1, %v2150_v47  ;;  %v2151_v22 = vmax.f32 %v1797_v53, %v2110_v59 }
 0x1a4   : > { %v2192_v4 = vadd.f32 %v3755_v1, %v2153_v33  ;;  %v2223_v10 = vmax.f32 %v2191_v55, 0.0 }
 0x1a5   : > { %v2190_v9 = vadd.f32 %v3755_v1, %v2151_v22  ;;  %v2221_v37 = vmax.f32 %v2189_v34, 0.0 }
 0x1a6   : > { %v2224_v36 = vmax.f32 %v2192_v4, 0.0 }
 0x1a7   : > { %v2222_v20 = vmax.f32 %v2190_v9, 0.0 }
 0x1a8   : > { %v2833_v7 = vpack.c.bf16 %v2224_v36, %v2223_v10 }
 0x1a9   : > { %v2828_v12 = vpack.c.bf16 %v2222_v20, %v2221_v37 }
 0x1aa   : > { %2849 = vst [vmem:[%s3776_s22 + $0x78] sm:$0xff] %v2833_v7  }
 0x1ab   : > { %2848 = vst [vmem:[%s3776_s22 + $0x70] sm:$0xff] %v2828_v12  }
 0x1ac PF: > { %p10_p9 = scmp.ge.s32.totalorder %s3258_s16, 4   ;;  %s4000_s12 = smov %s3214_s13 }
 0x1ad   : > { %s4001_s13 = smov %s3267_s19  ;;  %s4002_s14 = smov %s3258_s16 }
 0x1ae   :  { %12 = sbr.rel (!%p10_p9) target bundleno = 2 (0x2), region = 111 }

// kernel: net_forward.4
= control target key start
LH: loop header
LB: loop body
LE: loop exit
PB: predicated region body
PF: predicated region fallthrough
CT: control target
= control target key end

     0   :  { %v811_v0 = vmov 0   ;;  %vm131_vm0 = vcmask 179200   ;;  %vm144_vm1 = vcmask 1042432   ;;  %s1086_s1 = inlined_call_operand.vmem [shape: bf16[150,128], index: 1, kind: input, shape index: {}]   ;;  %s1087_s0 = inlined_call_operand.vmem [shape: bf16[4,56,150], index: 0, kind: input, shape index: {}]   ;;  %s1088_s2 = inlined_call_operand.vmem [shape: f32[1,128], index: 2, kind: input, shape index: {}]   ;;  %s1089_s3 = inlined_call_operand.vmem [shape: bf16[56,128], index: 3, kind: output, shape index: {}]  }
   0x1   :  { %148 = vmatprep.subr.bf16.mxu0 %v811_v0  ;;  %265 = vmatprep.subr.bf16.mxu1 %v811_v0  ;;  %v837_v1 = vld [vmem:[%s1086_s1] sm:$0xff]   ;;  %v844_v2 = vld [vmem:[%s1086_s1 + $0x8] sm:$0xff]   ;;  %v853_v3 = vld [vmem:[%s1086_s1 + $0x10] sm:$0xff]  }
   0x2   :  { %149 = vmatpush1.bf16.msra.mxu0 %v837_v1  ;;  %266 = vmatpush1.bf16.msra.mxu1 %v837_v1  ;;  %v862_v4 = vld [vmem:[%s1086_s1 + $0x18] sm:$0xff]   ;;  %v769_v5 = vld [vmem:[%s1087_s0 + $0x4] ss:$8 sps:$4 sm:$0xff]   ;;  %v897_v9 = vld [vmem:[%s1086_s1 + $0x30] sm:$0xff]  }
   0x3   :  { %150 = vmatprep.subr.bf16.mxu0 %v811_v0  ;;  %267 = vmatprep.subr.bf16.mxu1 %v811_v0  ;;  %v772_v6 = vld [vmem:[%s1087_s0 + $0x3c] ss:$8 sps:$4 sm:$0xff]   ;;  %v888_v8 = vld [vmem:[%s1086_s1 + $0x28] sm:$0xff]   ;;  %v770_v15 = vld [vmem:[%s1087_s0 + $0x38] ss:$8 sps:$4 sm:$0xff]  }
   0x4   :  { %663 = vmatprep.mubr.msk.bf16.mxu0 %vm131_vm0, %v769_v5  ;;  %v878_v7 = vld [vmem:[%s1086_s1 + $0x20] sm:$0xff]   ;;  %682 = vmatprep.mubr.msk.bf16.mxu1 %vm131_vm0, %v772_v6  ;;  %v906_v10 = vld [vmem:[%s1086_s1 + $0x38] sm:$0xff]   ;;  %v766_v12 = vld [vmem:[%s1086_s1 + $0x48] ss:$0 sps:$4 sm:$0x77]  }
   0x5   :  { %v915_v11 = vld [vmem:[%s1086_s1 + $0x40] sm:$0xff]   ;;  %v926_v13 = vsel %vm144_vm1, %v766_v12, 0  ;;  %v773_v16 = vld [vmem:[%s1087_s0 + $0x14] ss:$8 sps:$4 sm:$0xff]   ;;  %v775_v18 = vld [vmem:[%s1087_s0 + $0x10] ss:$8 sps:$4 sm:$0xff]  }
   0x6   :  { %151 = vmatpush1.bf16.msra.mxu0 %v844_v2  ;;  %268 = vmatpush1.bf16.msra.mxu1 %v844_v2  ;;  %v767_v14 = vld [vmem:[%s1087_s0] ss:$8 sps:$4 sm:$0xff]   ;;  %v776_v17 = vld [vmem:[%s1087_s0 + $0x4c] ss:$8 sps:$4 sm:$0xff]   ;;  %v782_v21 = vld [vmem:[%s1087_s0 + $0x5c] ss:$8 sps:$4 sm:$0xff]  }
   0x7   :  { %152 = vmatprep.subr.bf16.mxu0 %v811_v0  ;;  %269 = vmatprep.subr.bf16.mxu1 %v811_v0  ;;  %v778_v19 = vld [vmem:[%s1087_s0 + $0x48] ss:$8 sps:$4 sm:$0xff]   ;;  %v779_v20 = vld [vmem:[%s1087_s0 + $0x24] ss:$8 sps:$4 sm:$0xff]   ;;  %v784_v23 = vld [vmem:[%s1087_s0 + $0x58] ss:$8 sps:$4 sm:$0xff]  }
   0x8   :  { %v781_v22 = vld [vmem:[%s1087_s0 + $0x20] ss:$8 sps:$4 sm:$0xff]   ;;  %v40_v24 = vld [vmem:[%s1087_s0 + $0x30] sm:$0xff]  ;;  %v795_v34 = vld [vmem:[%s1087_s0 + $0x84] ss:$8 sps:$4 sm:$0xff]  }
   0x9   :  { %v673_v25 = vld [vmem:[%s1087_s0 + $0x68] sm:$0xff]  ;;  %v652_v26 = vcombine.high %v40_v24, %v40_v24  ;;  %v651_v28 = vcombine.low %v40_v24, %v40_v24  ;;  %v791_v30 = vld [vmem:[%s1087_s0 + $0x74] ss:$8 sps:$4 sm:$0xff]   ;;  %v789_v32 = vld [vmem:[%s1087_s0 + $0x70] ss:$8 sps:$4 sm:$0xff]  }
   0xa   :  { %153 = vmatpush1.bf16.msra.mxu0 %v853_v3  ;;  %270 = vmatpush1.bf16.msra.mxu1 %v853_v3  ;;  %v681_v27 = vcombine.high %v673_v25, %v673_v25  ;;  %v680_v29 = vcombine.low %v673_v25, %v673_v25  ;;  %v794_v31 = vld [vmem:[%s1087_s0 + $0xac] ss:$8 sps:$4 sm:$0xff]   ;;  %v792_v33 = vld [vmem:[%s1087_s0 + $0xa8] ss:$8 sps:$4 sm:$0xff]   ;;  %v797_v35 = vld [vmem:[%s1087_s0 + $0xbc] ss:$8 sps:$4 sm:$0xff]  }
   0xb   :  { %154 = vmatprep.subr.bf16.mxu0 %v811_v0  ;;  %271 = vmatprep.subr.bf16.mxu1 %v811_v0  ;;  %v799_v36 = vld [vmem:[%s1087_s0 + $0x80] ss:$8 sps:$4 sm:$0xff]   ;;  %v801_v38 = vld [vmem:[%s1087_s0 + $0x94] ss:$8 sps:$4 sm:$0xff]   ;;  %v805_v42 = vld [vmem:[%s1087_s0 + $0x90] ss:$8 sps:$4 sm:$0xff]  }
   0xc   :  { %v800_v37 = vld [vmem:[%s1087_s0 + $0xb8] ss:$8 sps:$4 sm:$0xff]   ;;  %v803_v39 = vld [vmem:[%s1087_s0 + $0xcc] ss:$8 sps:$4 sm:$0xff]   ;;  %v806_v43 = vld [vmem:[%s1087_s0 + $0xc8] ss:$8 sps:$4 sm:$0xff]  }
   0xd   :  { %v692_v40 = vld [vmem:[%s1087_s0 + $0xa0] sm:$0xff]  ;;  %v711_v41 = vld [vmem:[%s1087_s0 + $0xd8] sm:$0xff] }
   0xe   :  { %155 = vmatpush1.bf16.msra.mxu0 %v862_v4  ;;  %272 = vmatpush1.bf16.msra.mxu1 %v862_v4  ;;  %v700_v44 = vcombine.high %v692_v40, %v692_v40  ;;  %v719_v45 = vcombine.high %v711_v41, %v711_v41  ;;  %v699_v46 = vcombine.low %v692_v40, %v692_v40 }
   0xf   :  { %156 = vmatprep.subr.bf16.mxu0 %v811_v0  ;;  %273 = vmatprep.subr.bf16.mxu1 %v811_v0  ;;  %v718_v47 = vcombine.low %v711_v41, %v711_v41 }
  0x12   :  { %157 = vmatpush1.bf16.msra.mxu0 %v878_v7  ;;  %274 = vmatpush1.bf16.msra.mxu1 %v878_v7 }
  0x13   :  { %158 = vmatprep.subr.bf16.mxu0 %v811_v0  ;;  %275 = vmatprep.subr.bf16.mxu1 %v811_v0 }
  0x16   :  { %159 = vmatpush1.bf16.msra.mxu0 %v888_v8  ;;  %276 = vmatpush1.bf16.msra.mxu1 %v888_v8 }
  0x17   :  { %160 = vmatprep.subr.bf16.mxu0 %v811_v0  ;;  %277 = vmatprep.subr.bf16.mxu1 %v811_v0 }
  0x1a   :  { %161 = vmatpush1.bf16.msra.mxu0 %v897_v9  ;;  %278 = vmatpush1.bf16.msra.mxu1 %v897_v9 }
  0x1b   :  { %162 = vmatprep.subr.bf16.mxu0 %v811_v0  ;;  %279 = vmatprep.subr.bf16.mxu1 %v811_v0 }
  0x1e   :  { %163 = vmatpush1.bf16.msra.mxu0 %v906_v10  ;;  %280 = vmatpush1.bf16.msra.mxu1 %v906_v10 }
  0x1f   :  { %164 = vmatprep.subr.bf16.mxu0 %v811_v0  ;;  %281 = vmatprep.subr.bf16.mxu1 %v811_v0 }
  0x22   :  { %165 = vmatpush1.bf16.msra.mxu0 %v915_v11  ;;  %282 = vmatpush1.bf16.msra.mxu1 %v915_v11 }
  0x23   :  { %166 = vmatprep.subr.bf16.mxu0 %v811_v0  ;;  %283 = vmatprep.subr.bf16.mxu1 %v811_v0 }
  0x26   :  { %167 = vmatpush1.bf16.msra.mxu0 %v926_v13  ;;  %284 = vmatpush1.bf16.msra.mxu1 %v926_v13 }
  0x27   :  { %389 = vmatprep.subr.bf16.mxu0 %v811_v0  ;;  %513 = vmatprep.subr.bf16.mxu1 %v811_v0 }
  0x29   :  { %181 = vmatmul.mubr.bf16.vlgmr.msra.gmra.mrb[0].mxu0 %v767_v14  ;;  %298 = vmatmul.mubr.bf16.vlgmr.msra.gmra.mrb[0].mxu1 %v770_v15 }
  0x2a   :  { %390 = vmatpush1.bf16.msra.mxu0 %v837_v1  ;;  %514 = vmatpush1.bf16.msra.mxu1 %v837_v1 }
  0x2b   :  { %391 = vmatprep.subr.bf16.mxu0 %v811_v0  ;;  %515 = vmatprep.subr.bf16.mxu1 %v811_v0 }
  0x2c   :  { %664 = vmatprep.mubr.msk.bf16.mxu0 %vm131_vm0, %v773_v16  ;;  %683 = vmatprep.mubr.msk.bf16.mxu1 %vm131_vm0, %v776_v17 }
  0x2e   :  { %392 = vmatpush1.bf16.msra.mxu0 %v844_v2  ;;  %516 = vmatpush1.bf16.msra.mxu1 %v844_v2 }
  0x2f   :  { %393 = vmatprep.subr.bf16.mxu0 %v811_v0  ;;  %517 = vmatprep.subr.bf16.mxu1 %v811_v0 }
  0x31   :  { %189 = vmatmul.mubr.bf16.gmra.mrb[4].mxu0 %v775_v18  ;;  %306 = vmatmul.mubr.bf16.gmra.mrb[4].mxu1 %v778_v19 }
  0x32   :  { %394 = vmatpush1.bf16.msra.mxu0 %v853_v3  ;;  %518 = vmatpush1.bf16.msra.mxu1 %v853_v3 }
  0x33   :  { %395 = vmatprep.subr.bf16.mxu0 %v811_v0  ;;  %519 = vmatprep.subr.bf16.mxu1 %v811_v0 }
  0x34   :  { %665 = vmatprep.mubr.msk.bf16.mxu0 %vm131_vm0, %v779_v20  ;;  %684 = vmatprep.mubr.msk.bf16.mxu1 %vm131_vm0, %v782_v21 }
  0x36   :  { %396 = vmatpush1.bf16.msra.mxu0 %v862_v4  ;;  %520 = vmatpush1.bf16.msra.mxu1 %v862_v4 }
  0x37   :  { %397 = vmatprep.subr.bf16.mxu0 %v811_v0  ;;  %521 = vmatprep.subr.bf16.mxu1 %v811_v0 }
  0x39   :  { %197 = vmatmul.mubr.bf16.gmra.mrb[8].mxu0 %v781_v22  ;;  %314 = vmatmul.mubr.bf16.gmra.mrb[8].mxu1 %v784_v23 }
  0x3a   :  { %398 = vmatpush1.bf16.msra.mxu0 %v878_v7  ;;  %522 = vmatpush1.bf16.msra.mxu1 %v878_v7 }
  0x3b   :  { %399 = vmatprep.subr.bf16.mxu0 %v811_v0  ;;  %523 = vmatprep.subr.bf16.mxu1 %v811_v0 }
  0x3c   :  { %666 = vmatprep.mubr.msk.bf16.mxu0 %vm131_vm0, %v652_v26  ;;  %685 = vmatprep.mubr.msk.bf16.mxu1 %vm131_vm0, %v681_v27 }
  0x3e   :  { %400 = vmatpush1.bf16.msra.mxu0 %v888_v8  ;;  %524 = vmatpush1.bf16.msra.mxu1 %v888_v8 }
  0x3f   :  { %401 = vmatprep.subr.bf16.mxu0 %v811_v0  ;;  %525 = vmatprep.subr.bf16.mxu1 %v811_v0 }
  0x41   :  { %205 = vmatmul.mubr.bf16.gmra.mrb[12].mxu0 %v651_v28  ;;  %322 = vmatmul.mubr.bf16.gmra.mrb[12].mxu1 %v680_v29  ;;  %v724_v28 = vld [vmem:[%s1088_s2] ss:$0 sm:$0xff] }
  0x42   :  { %402 = vmatpush1.bf16.msra.mxu0 %v897_v9  ;;  %526 = vmatpush1.bf16.msra.mxu1 %v897_v9 }
  0x43   :  { %403 = vmatprep.subr.bf16.mxu0 %v811_v0  ;;  %527 = vmatprep.subr.bf16.mxu1 %v811_v0 }
  0x44   :  { %701 = vmatprep.mubr.msk.bf16.mxu0 %vm131_vm0, %v791_v30  ;;  %720 = vmatprep.mubr.msk.bf16.mxu1 %vm131_vm0, %v794_v31 }
  0x46   :  { %404 = vmatpush1.bf16.msra.mxu0 %v906_v10  ;;  %528 = vmatpush1.bf16.msra.mxu1 %v906_v10 }
  0x47   :  { %405 = vmatprep.subr.bf16.mxu0 %v811_v0  ;;  %529 = vmatprep.subr.bf16.mxu1 %v811_v0 }
  0x4a   :  { %406 = vmatpush1.bf16.msra.mxu0 %v915_v11  ;;  %530 = vmatpush1.bf16.msra.mxu1 %v915_v11 }
  0x4b   :  { %407 = vmatprep.subr.bf16.mxu0 %v811_v0  ;;  %531 = vmatprep.subr.bf16.mxu1 %v811_v0 }
  0x4e   :  { %408 = vmatpush1.bf16.msra.mxu0 %v926_v13  ;;  %532 = vmatpush1.bf16.msra.mxu1 %v926_v13 }
  0x51   :  { %422 = vmatmul.mubr.bf16.vlgmr.msra.gmra.mrb[16].mxu0 %v789_v32  ;;  %546 = vmatmul.mubr.bf16.vlgmr.msra.gmra.mrb[16].mxu1 %v792_v33 }
  0x52   :  { %702 = vmatprep.mubr.msk.bf16.mxu0 %vm131_vm0, %v795_v34  ;;  %721 = vmatprep.mubr.msk.bf16.mxu1 %vm131_vm0, %v797_v35 }
  0x59   :  { %430 = vmatmul.mubr.bf16.gmra.mrb[20].mxu0 %v799_v36  ;;  %554 = vmatmul.mubr.bf16.gmra.mrb[20].mxu1 %v800_v37 }
  0x5a   :  { %703 = vmatprep.mubr.msk.bf16.mxu0 %vm131_vm0, %v801_v38  ;;  %722 = vmatprep.mubr.msk.bf16.mxu1 %vm131_vm0, %v803_v39 }
  0x61   :  { %438 = vmatmul.mubr.bf16.gmra.mrb[24].mxu0 %v805_v42  ;;  %562 = vmatmul.mubr.bf16.gmra.mrb[24].mxu1 %v806_v43 }
  0x62   :  { %704 = vmatprep.mubr.msk.bf16.mxu0 %vm131_vm0, %v700_v44  ;;  %723 = vmatprep.mubr.msk.bf16.mxu1 %vm131_vm0, %v719_v45 }
  0x69   :  { %446 = vmatmul.mubr.bf16.gmra.mrb[28].mxu0 %v699_v46  ;;  %570 = vmatmul.mubr.bf16.gmra.mrb[28].mxu1 %v718_v47 }
  0xfc   :  { %v182_v48 = vpop.f32.mrb[0].mxu0  ;;  %v299_v49 = vpop.f32.mrb[0].mxu1 }
  0xfd   :  { %v329_v50 = vmax.f32 %v182_v48, %v299_v49  ;;  %v184_v51 = vpop.f32.mrb[1].mxu0  ;;  %v301_v52 = vpop.f32.mrb[1].mxu1 }
  0xfe   :  { %v185_v53 = vpop.f32.mrb[2].mxu0  ;;  %v302_v54 = vpop.f32.mrb[2].mxu1 }
  0xff   :  { %v330_v55 = vmax.f32 %v185_v53, %v302_v54  ;;  %v187_v56 = vpop.f32.mrb[3].mxu0  ;;  %v304_v57 = vpop.f32.mrb[3].mxu1 }
 0x104   :  { %v190_v58 = vpop.f32.mrb[4].mxu0  ;;  %v307_v59 = vpop.f32.mrb[4].mxu1 }
 0x105   :  { %v192_v60 = vpop.f32.mrb[5].mxu0  ;;  %v331_v61 = vmax.f32 %v190_v58, %v307_v59  ;;  %v309_v62 = vpop.f32.mrb[5].mxu1 }
 0x106   :  { %v193_v63 = vpop.f32.mrb[6].mxu0  ;;  %v310_v0 = vpop.f32.mrb[6].mxu1 }
 0x107   :  { %v195_v1 = vpop.f32.mrb[7].mxu0  ;;  %v332_v2 = vmax.f32 %v193_v63, %v310_v0  ;;  %v312_v3 = vpop.f32.mrb[7].mxu1 }
 0x10c   :  { %v198_v4 = vpop.f32.mrb[8].mxu0  ;;  %v315_v5 = vpop.f32.mrb[8].mxu1 }
 0x10d   :  { %v200_v6 = vpop.f32.mrb[9].mxu0  ;;  %v333_v7 = vmax.f32 %v198_v4, %v315_v5  ;;  %v317_v8 = vpop.f32.mrb[9].mxu1 }
 0x10e   :  { %v201_v9 = vpop.f32.mrb[10].mxu0  ;;  %v318_v10 = vpop.f32.mrb[10].mxu1 }
 0x10f   :  { %v203_v11 = vpop.f32.mrb[11].mxu0  ;;  %v334_v12 = vmax.f32 %v201_v9, %v318_v10  ;;  %v320_v13 = vpop.f32.mrb[11].mxu1 }
 0x114   :  { %v1062_v14 = vpop.f32.mrb[12].mxu0  ;;  %v1064_v15 = vpop.f32.mrb[12].mxu1 }
 0x115   :  { %v208_v16 = vpop.f32.mrb[13].mxu0  ;;  %v335_v17 = vmax.f32 %v1062_v14, %v1064_v15  ;;  %v325_v18 = vpop.f32.mrb[13].mxu1 }
 0x116   :  { %v209_v19 = vpop.f32.mrb[14].mxu0  ;;  %v326_v20 = vpop.f32.mrb[14].mxu1 }
 0x117   :  { %v210_v21 = vpop.f32.mrb[15].mxu0  ;;  %v327_v22 = vpop.f32.mrb[15].mxu1 }
 0x124   :  { %v423_v23 = vpop.f32.mrb[16].mxu0  ;;  %v547_v24 = vpop.f32.mrb[16].mxu1 }
 0x125   :  { %v453_v25 = vmax.f32 %v329_v50, %v423_v23  ;;  %v425_v26 = vpop.f32.mrb[17].mxu0  ;;  %v549_v27 = vpop.f32.mrb[17].mxu1 }
 0x126   :  { %v426_v29 = vpop.f32.mrb[18].mxu0  ;;  %v550_v30 = vpop.f32.mrb[18].mxu1 }
 0x127   :  { %v577_v31 = vmax.f32 %v453_v25, %v547_v24  ;;  %v454_v32 = vmax.f32 %v330_v55, %v426_v29  ;;  %v428_v33 = vpop.f32.mrb[19].mxu0  ;;  %v552_v34 = vpop.f32.mrb[19].mxu1 }
 0x129   :  { %v591_v35 = vadd.f32 %v724_v28, %v577_v31  ;;  %v578_v36 = vmax.f32 %v454_v32, %v550_v30 }
 0x12b   :  { %v592_v37 = vadd.f32 %v724_v28, %v578_v36  ;;  %v598_v40 = vmax.f32 %v591_v35, 0.0 }
 0x12c   :  { %v431_v38 = vpop.f32.mrb[20].mxu0  ;;  %v555_v39 = vpop.f32.mrb[20].mxu1 }
 0x12d   :  { %v599_v41 = vmax.f32 %v592_v37, 0.0  ;;  %v455_v42 = vmax.f32 %v331_v61, %v431_v38  ;;  %v433_v43 = vpop.f32.mrb[21].mxu0  ;;  %v557_v44 = vpop.f32.mrb[21].mxu1 }
 0x12e   :  { %v434_v45 = vpop.f32.mrb[22].mxu0  ;;  %v558_v46 = vpop.f32.mrb[22].mxu1 }
 0x12f   :  { %v742_v47 = vpack.c.bf16 %v599_v41, %v598_v40  ;;  %v579_v48 = vmax.f32 %v455_v42, %v555_v39  ;;  %v456_v49 = vmax.f32 %v332_v2, %v434_v45  ;;  %v436_v50 = vpop.f32.mrb[23].mxu0  ;;  %v560_v51 = vpop.f32.mrb[23].mxu1 }
 0x131   :  { %743 = vst [vmem:[%s1089_s3] sm:$0xff] %v742_v47   ;;  %v593_v52 = vadd.f32 %v724_v28, %v579_v48  ;;  %v580_v53 = vmax.f32 %v456_v49, %v558_v46 }
 0x133   :  { %v594_v54 = vadd.f32 %v724_v28, %v580_v53  ;;  %v600_v57 = vmax.f32 %v593_v52, 0.0 }
 0x134   :  { %v439_v55 = vpop.f32.mrb[24].mxu0  ;;  %v563_v56 = vpop.f32.mrb[24].mxu1 }
 0x135   :  { %v601_v58 = vmax.f32 %v594_v54, 0.0  ;;  %v457_v59 = vmax.f32 %v333_v7, %v439_v55  ;;  %v441_v60 = vpop.f32.mrb[25].mxu0  ;;  %v565_v61 = vpop.f32.mrb[25].mxu1 }
 0x136   :  { %v442_v62 = vpop.f32.mrb[26].mxu0  ;;  %v566_v63 = vpop.f32.mrb[26].mxu1 }
 0x137   :  { %v747_v0 = vpack.c.bf16 %v601_v58, %v600_v57  ;;  %v581_v1 = vmax.f32 %v457_v59, %v563_v56  ;;  %v458_v2 = vmax.f32 %v334_v12, %v442_v62  ;;  %v444_v3 = vpop.f32.mrb[27].mxu0  ;;  %v568_v4 = vpop.f32.mrb[27].mxu1 }
 0x139   :  { %754 = vst [vmem:[%s1089_s3 + $0x8] sm:$0xff] %v747_v0   ;;  %v595_v5 = vadd.f32 %v724_v28, %v581_v1  ;;  %v582_v6 = vmax.f32 %v458_v2, %v566_v63 }
 0x13b   :  { %v596_v8 = vadd.f32 %v724_v28, %v582_v6  ;;  %v602_v11 = vmax.f32 %v595_v5, 0.0 }
 0x13c   :  { %v447_v9 = vpop.f32.mrb[28].mxu0  ;;  %v571_v10 = vpop.f32.mrb[28].mxu1 }
 0x13d   :  { %v603_v7 = vmax.f32 %v596_v8, 0.0  ;;  %v459_v13 = vmax.f32 %v335_v17, %v447_v9  ;;  %v449_v16 = vpop.f32.mrb[29].mxu0  ;;  %v573_v18 = vpop.f32.mrb[29].mxu1 }
 0x13e   :  { %v450_v12 = vpop.f32.mrb[30].mxu0  ;;  %v574_v19 = vpop.f32.mrb[30].mxu1 }
 0x13f   :  { %v752_v20 = vpack.c.bf16 %v603_v7, %v602_v11  ;;  %v583_v21 = vmax.f32 %v459_v13, %v571_v10  ;;  %v451_v22 = vpop.f32.mrb[31].mxu0  ;;  %v575_v23 = vpop.f32.mrb[31].mxu1 }
 0x141   :  { %755 = vst [vmem:[%s1089_s3 + $0x10] sm:$0xff] %v752_v20   ;;  %v597_v24 = vadd.f32 %v724_v28, %v583_v21 }
 0x143   :  { %v604_v25 = vmax.f32 %v597_v24, 0.0 }
 0x145   :  { %v738_v26 = vpack.c.bf16 %v604_v25, %v604_v25 }
 0x147   :  { %640 = vst [vmem:[%s1089_s3 + $0x18] sm:$0xf] %v738_v26 }

// kernel: net_forward.5
= control target key start
LH: loop header
LB: loop body
LE: loop exit
PB: predicated region body
PF: predicated region fallthrough
CT: control target
= control target key end

     0   :  { %v741_v0 = vmov 0   ;;  %vm249_vm0 = vcmask 130048   ;;  %v742_v32 = vmov 0.0   ;;  %vm743_vm1 = vmmov 0   ;;  %s952_s1 = inlined_call_operand.vmem [shape: bf16[400,128], index: 1, kind: input, shape index: {}]   ;;  %s953_s0 = inlined_call_operand.vmem [shape: bf16[8,400], index: 0, kind: input, shape index: {}]   ;;  %s954_s3 = inlined_call_operand.vmem [shape: bf16[128,128], index: 3, kind: input, shape index: {}]   ;;  %s955_s5 = inlined_call_operand.vmem [shape: bf16[128,128], index: 5, kind: input, shape index: {}]   ;;  %s956_s2 = inlined_call_operand.vmem [shape: f32[1,128], index: 2, kind: input, shape index: {}]   ;;  %s957_s4 = inlined_call_operand.vmem [shape: f32[1,128], index: 4, kind: input, shape index: {}]   ;;  %s958_s6 = inlined_call_operand.vmem [shape: f32[1,128], index: 6, kind: input, shape index: {}]   ;;  %s959_s7 = inlined_call_operand.vmem [shape: f32[8,128], index: 7, kind: output, shape index: {}]  }
   0x1   :  { %293 = vmatprep.subr.bf16.mxu1 %v741_v0  ;;  %v696_v1 = vld [vmem:[%s952_s1 + $0x40] sm:$0xff]   ;;  %v699_v4 = vld [vmem:[%s952_s1 + $0x48] sm:$0xff]   ;;  %v702_v7 = vld [vmem:[%s952_s1 + $0x50] sm:$0xff]  }
   0x2   :  { %v697_v2 = vld [vmem:[%s952_s1 + $0x80] sm:$0xff]   ;;  %613 = vmatprep.subr.bf16.mxu0 %v696_v1  ;;  %v700_v5 = vld [vmem:[%s952_s1 + $0x88] sm:$0xff]   ;;  %v703_v8 = vld [vmem:[%s952_s1 + $0x90] sm:$0xff]  }
   0x3   :  { %v698_v3 = vld [vmem:[%s952_s1] sm:$0xff]   ;;  %294 = vmatpush1.bf16.msra.mxu1 %v697_v2  ;;  %v701_v6 = vld [vmem:[%s952_s1 + $0x8] sm:$0xff]   ;;  %v704_v9 = vld [vmem:[%s952_s1 + $0x10] sm:$0xff]  }
   0x4   :  { %614 = vmatpush3.bf16.msra.mxu0 %v698_v3  ;;  %295 = vmatprep.subr.bf16.mxu1 %v741_v0  ;;  %v705_v10 = vld [vmem:[%s952_s1 + $0x58] sm:$0xff]   ;;  %v708_v13 = vld [vmem:[%s952_s1 + $0x60] sm:$0xff]   ;;  %v711_v16 = vld [vmem:[%s952_s1 + $0x68] sm:$0xff]  }
   0x5   :  { %615 = vmatprep.subr.bf16.mxu0 %v699_v4  ;;  %v706_v11 = vld [vmem:[%s952_s1 + $0x98] sm:$0xff]   ;;  %v709_v14 = vld [vmem:[%s952_s1 + $0xa0] sm:$0xff]   ;;  %v712_v17 = vld [vmem:[%s952_s1 + $0xa8] sm:$0xff]  }
   0x6   :  { %v707_v12 = vld [vmem:[%s952_s1 + $0x18] sm:$0xff]   ;;  %v710_v15 = vld [vmem:[%s952_s1 + $0x20] sm:$0xff]   ;;  %v713_v18 = vld [vmem:[%s952_s1 + $0x28] sm:$0xff]  }
   0x7   :  { %296 = vmatpush1.bf16.msra.mxu1 %v700_v5  ;;  %v714_v19 = vld [vmem:[%s952_s1 + $0x70] sm:$0xff]   ;;  %v27_v22 = vld [vmem:[%s953_s0] sm:$0xff]  ;;  %v717_v23 = vld [vmem:[%s952_s1 + $0x78] sm:$0xff]  }
   0x8   :  { %616 = vmatpush3.bf16.msra.mxu0 %v701_v6  ;;  %297 = vmatprep.subr.bf16.mxu1 %v741_v0  ;;  %v715_v20 = vld [vmem:[%s952_s1 + $0xb0] sm:$0xff]   ;;  %v566_v24 = vcombine.high %v27_v22, %v27_v22  ;;  %v28_v25 = vld [vmem:[%s953_s0 + $0x8] sm:$0xff]  ;;  %v718_v27 = vld [vmem:[%s952_s1 + $0xb8] sm:$0xff]   ;;  %v565_v30 = vcombine.low %v27_v22, %v27_v22 }
   0x9   :  { %617 = vmatprep.subr.bf16.mxu0 %v702_v7  ;;  %v716_v21 = vld [vmem:[%s952_s1 + $0x30] sm:$0xff]   ;;  %v568_v26 = vcombine.high %v28_v25, %v28_v25  ;;  %v719_v28 = vld [vmem:[%s952_s1 + $0x38] sm:$0xff]   ;;  %v722_v29 = vld [vmem:[%s952_s1 + $0xc0] sm:$0xff]   ;;  %v567_v33 = vcombine.low %v28_v25, %v28_v25 }
   0xa   :  { %285 = vmatprep.mubr.bf16.mxu0 %v566_v24  ;;  %v725_v31 = vld [vmem:[%s954_s3] sm:$0xff]   ;;  %v726_v34 = vld [vmem:[%s954_s3 + $0x8] sm:$0xff]   ;;  %v727_v35 = vld [vmem:[%s954_s3 + $0x10] sm:$0xff]  }
   0xb   :  { %298 = vmatpush1.bf16.msra.mxu1 %v703_v8  ;;  %594 = vmatprep.mubr.msk.bf16.mxu1 %vm249_vm0, %v568_v26  ;;  %v728_v36 = vld [vmem:[%s954_s3 + $0x18] sm:$0xff]   ;;  %v729_v37 = vld [vmem:[%s954_s3 + $0x20] sm:$0xff]   ;;  %v730_v38 = vld [vmem:[%s954_s3 + $0x28] sm:$0xff]  }
   0xc   :  { %618 = vmatpush3.bf16.msra.mxu0 %v704_v9  ;;  %299 = vmatprep.subr.bf16.mxu1 %v741_v0  ;;  %v731_v39 = vld [vmem:[%s954_s3 + $0x30] sm:$0xff]   ;;  %v732_v40 = vld [vmem:[%s954_s3 + $0x38] sm:$0xff]   ;;  %v733_v41 = vld [vmem:[%s955_s5] sm:$0xff]  }
   0xd   :  { %619 = vmatprep.subr.bf16.mxu0 %v705_v10  ;;  %v734_v42 = vld [vmem:[%s955_s5 + $0x8] sm:$0xff]   ;;  %v735_v43 = vld [vmem:[%s955_s5 + $0x10] sm:$0xff]   ;;  %v736_v44 = vld [vmem:[%s955_s5 + $0x18] sm:$0xff]  }
   0xe   :  { %v737_v45 = vld [vmem:[%s955_s5 + $0x20] sm:$0xff]   ;;  %v738_v46 = vld [vmem:[%s955_s5 + $0x28] sm:$0xff]   ;;  %v739_v61 = vld [vmem:[%s955_s5 + $0x30] sm:$0xff]  }
   0xf   :  { %300 = vmatpush1.bf16.msra.mxu1 %v706_v11  ;;  %v564_v49 = vld [vmem:[%s956_s2] ss:$0 sm:$0xff]  ;;  %v740_v62 = vld [vmem:[%s955_s5 + $0x38] sm:$0xff]  }
  0x10   :  { %620 = vmatpush3.bf16.msra.mxu0 %v707_v12  ;;  %301 = vmatprep.subr.bf16.mxu1 %v741_v0  ;;  %v595_v63 = vld [vmem:[%s957_s4] ss:$0 sm:$0xff] }
  0x11   :  { %621 = vmatprep.subr.bf16.mxu0 %v708_v13  ;;  %v604_v7 = vld [vmem:[%s958_s6] ss:$0 sm:$0xff] }
  0x13   :  { %302 = vmatpush1.bf16.msra.mxu1 %v709_v14 }
  0x14   :  { %622 = vmatpush3.bf16.msra.mxu0 %v710_v15  ;;  %303 = vmatprep.subr.bf16.mxu1 %v741_v0 }
  0x15   :  { %623 = vmatprep.subr.bf16.mxu0 %v711_v16 }
  0x17   :  { %304 = vmatpush1.bf16.msra.mxu1 %v712_v17 }
  0x18   :  { %624 = vmatpush3.bf16.msra.mxu0 %v713_v18  ;;  %305 = vmatprep.subr.bf16.mxu1 %v741_v0 }
  0x19   :  { %625 = vmatprep.subr.bf16.mxu0 %v714_v19 }
  0x1b   :  { %306 = vmatpush1.bf16.msra.mxu1 %v715_v20 }
  0x1c   :  { %626 = vmatpush3.bf16.msra.mxu0 %v716_v21  ;;  %307 = vmatprep.subr.bf16.mxu1 %v741_v0 }
  0x1d   :  { %627 = vmatprep.subr.bf16.mxu0 %v717_v23 }
  0x1f   :  { %308 = vmatpush1.bf16.msra.mxu1 %v718_v27 }
  0x20   :  { %628 = vmatpush3.bf16.msra.mxu0 %v719_v28  ;;  %309 = vmatprep.subr.bf16.mxu1 %v741_v0 }
  0x21   :  { %653 = vmatprep.subr.bf16.mxu0 %v742_v32 }
  0x23   :  { %286 = vmatmul.mubr.bf16.vlgmr.msra.gmra.mrb[0].mxu0 %v565_v30  ;;  %310 = vmatpush1.bf16.msra.mxu1 %v722_v29 }
  0x24   :  { %654 = vmatpush3.bf16.msra.mxu0 %v725_v31  ;;  %673 = vmatprep.subr.bf16.mxu1 %v742_v32 }
  0x25   :  { %655 = vmatprep.subr.bf16.mxu0 %v742_v32  ;;  %669 = vmatprep.mubr.msk.bf16.mxu0 %vm743_vm1, %v742_v32 }
  0x26   :  { %326 = vmatmul.mubr.bf16.vlgmr.msra.gmra.mrb[0].mxu1 %v567_v33 }
  0x27   :  { %689 = vmatprep.mubr.msk.bf16.mxu1 %vm743_vm1, %v742_v32  ;;  %674 = vmatpush3.bf16.msra.mxu1 %v733_v41 }
  0x28   :  { %656 = vmatpush3.bf16.msra.mxu0 %v726_v34  ;;  %675 = vmatprep.subr.bf16.mxu1 %v742_v32 }
  0x29   :  { %657 = vmatprep.subr.bf16.mxu0 %v742_v32 }
  0x2b   :  { %676 = vmatpush3.bf16.msra.mxu1 %v734_v42 }
  0x2c   :  { %658 = vmatpush3.bf16.msra.mxu0 %v727_v35  ;;  %677 = vmatprep.subr.bf16.mxu1 %v742_v32 }
  0x2d   :  { %659 = vmatprep.subr.bf16.mxu0 %v742_v32 }
  0x2f   :  { %678 = vmatpush3.bf16.msra.mxu1 %v735_v43 }
  0x30   :  { %660 = vmatpush3.bf16.msra.mxu0 %v728_v36  ;;  %679 = vmatprep.subr.bf16.mxu1 %v742_v32 }
  0x31   :  { %661 = vmatprep.subr.bf16.mxu0 %v742_v32 }
  0x33   :  { %680 = vmatpush3.bf16.msra.mxu1 %v736_v44 }
  0x34   :  { %662 = vmatpush3.bf16.msra.mxu0 %v729_v37  ;;  %681 = vmatprep.subr.bf16.mxu1 %v742_v32 }
  0x35   :  { %663 = vmatprep.subr.bf16.mxu0 %v742_v32 }
  0x37   :  { %682 = vmatpush3.bf16.msra.mxu1 %v737_v45 }
  0x38   :  { %664 = vmatpush3.bf16.msra.mxu0 %v730_v38  ;;  %683 = vmatprep.subr.bf16.mxu1 %v742_v32 }
  0x39   :  { %665 = vmatprep.subr.bf16.mxu0 %v742_v32 }
  0x3b   :  { %684 = vmatpush3.bf16.msra.mxu1 %v738_v46 }
  0x3c   :  { %666 = vmatpush3.bf16.msra.mxu0 %v731_v39  ;;  %685 = vmatprep.subr.bf16.mxu1 %v742_v32 }
  0x3d   :  { %667 = vmatprep.subr.bf16.mxu0 %v742_v32 }
  0x3f   :  { %686 = vmatpush3.bf16.msra.mxu1 %v739_v61 }
  0x40   :  { %668 = vmatpush3.bf16.msra.mxu0 %v732_v40  ;;  %687 = vmatprep.subr.bf16.mxu1 %v742_v32 }
  0x43   :  { %688 = vmatpush3.bf16.msra.mxu1 %v740_v62 }
  0xf6   :  { %v629_v47 = vpop.f32.mrb[0].mxu0 }
  0xf7   :  { %v630_v48 = vpop.f32.mrb[1].mxu0 }
  0xf8   :  { %v631_v50 = vadd.f32 %v630_v48, %v629_v47  ;;  %v632_v51 = vpop.f32.mrb[2].mxu0 }
  0xf9   :  { %v633_v52 = vpop.f32.mrb[3].mxu0  ;;  %v327_v53 = vpop.f32.mrb[0].mxu1 }
  0xfa   :  { %v288_v54 = vadd.f32 %v631_v50, %v564_v49  ;;  %v329_v55 = vpop.f32.mrb[1].mxu1 }
  0xfb   :  { %v330_v56 = vpop.f32.mrb[2].mxu1 }
  0xfc   :  { %v328_v57 = vadd.f32 %v327_v53, %v288_v54  ;;  %v331_v58 = vpop.f32.mrb[3].mxu1 }
  0xfe   :  { %v333_v59 = vmax.f32 %v328_v57, 0.0 }
 0x100   :  { %v334_v60 = vpack.c.bf16 %v333_v59, %v333_v59 }
 0x102   :  { %670 = vmatmul.mubr.bf16.vlgmr.msra.gmra.mrb[4].mxu0 %v334_v60 }
 0x1d5   :  { %v440_v0 = vpop.f32.mrb[4].mxu0 }
 0x1d6   :  { %v441_v1 = vadd.f32 %v595_v63, %v440_v0  ;;  %v671_v2 = vpop.f32.mrb[5].mxu0 }
 0x1d7   :  { %v443_v3 = vpop.f32.mrb[6].mxu0 }
 0x1d8   :  { %v446_v4 = vmax.f32 %v441_v1, 0.0  ;;  %v672_v5 = vpop.f32.mrb[7].mxu0 }
 0x1da   :  { %v447_v6 = vpack.c.bf16 %v446_v4, %v446_v4 }
 0x1dc   :  { %690 = vmatmul.mubr.bf16.vlgmr.msra.gmra.mrb[4].mxu1 %v447_v6 }
 0x2af   :  { %v553_v8 = vpop.f32.mrb[4].mxu1 }
 0x2b0   :  { %v554_v9 = vadd.f32 %v604_v7, %v553_v8  ;;  %v691_v10 = vpop.f32.mrb[5].mxu1 }
 0x2b1   :  { %v556_v11 = vpop.f32.mrb[6].mxu1 }
 0x2b2   :  { %559 = vst [vmem:[%s959_s7] sm:$0xff] %v554_v9  ;;  %v692_v12 = vpop.f32.mrb[7].mxu1 }

</bundles_post_ra>
